<compile_context>
chip_gen: v6e
topology: v6e:2x2x1
jax: 0.10.0
libtpu: 0.0.40
codegen_flags: <defaults>
</compile_context>

<pallas_src>
import functools
import math

import jax
import jax.numpy as jnp
from jax import lax
from jax.experimental import pallas as pl
from jax.experimental.pallas import tpu as pltpu


def _round_up(x, m):
    return ((x + m - 1) // m) * m


def _label_smoothing_kernel(x_ref, tgt_ref, out_ref, *, padding_idx,
                            confidence, smooth_val, log_conf, log_smooth):
    # x_ref:   (TM, V)  float32 log-probs
    # tgt_ref: (TM, 1)  int32 targets
    # out_ref: (TM, 1)  float32 per-row partial KL sums (block-local)
    x = x_ref[...]
    tgt = tgt_ref[...]
    tm, v = x.shape

    col = lax.broadcasted_iota(jnp.int32, (tm, v), 1)

    # true_dist has only two non-zero values -> logs are compile-time constants.
    conf_term = jnp.float32(confidence) * (jnp.float32(log_conf) - x)
    smooth_term = jnp.float32(smooth_val) * (jnp.float32(log_smooth) - x)
    term = jnp.where(col == tgt, conf_term, smooth_term)

    # Zero the padding column and whole rows whose target is the padding index.
    zero_mask = jnp.logical_or(col == padding_idx, tgt == padding_idx)
    term = jnp.where(zero_mask, jnp.float32(0.0), term)

    # Per-row partial sums; no cross-block carry, so the grid axis is parallel.
    out_ref[...] = jnp.sum(term, axis=1, keepdims=True)


def label_smoothing_loss(x, target, *, size, padding_idx, smoothing,
                         tile_rows=None):
    """x: (N, size) float32 log-probs; target: (N,) int indices. Returns scalar loss."""
    n, v = x.shape
    assert v == size
    confidence = 1.0 - smoothing
    smooth_val = smoothing / (size - 2)
    # Guard log(0): when a coefficient is exactly 0 its term is 0 anyway, so the
    # placeholder log value never contributes.
    log_conf = math.log(confidence) if confidence > 0.0 else 0.0
    log_smooth = math.log(smooth_val) if smooth_val > 0.0 else 0.0

    # Tile selection: ~8 MiB of x per tile -> ~16 MiB double-buffered VMEM,
    # which fits all generations (v7x has 64 MiB physical) with headroom.
    if tile_rows is None:
        budget_bytes = 8 * 1024 * 1024
        tile_rows = max(8, (budget_bytes // (v * 4)) // 8 * 8)
    tile_rows = max(8, _round_up(int(tile_rows), 8))
    tile_rows = min(tile_rows, _round_up(n, 8))

    n_padded = _round_up(n, tile_rows)
    num_blocks = n_padded // tile_rows

    # Pad tail rows with target = padding_idx so they contribute exactly 0.
    x_p = x.astype(jnp.float32)
    tgt_p = target.astype(jnp.int32)
    if n_padded != n:
        x_p = jnp.pad(x_p, ((0, n_padded - n), (0, 0)))
        tgt_p = jnp.pad(tgt_p, ((0, n_padded - n),),
                        constant_values=padding_idx)
    tgt2d = tgt_p.reshape(n_padded, 1)

    kernel = functools.partial(
        _label_smoothing_kernel,
        padding_idx=padding_idx, confidence=confidence,
        smooth_val=smooth_val, log_conf=log_conf, log_smooth=log_smooth)

    row_sums = pl.pallas_call(
        kernel,
        out_shape=jax.ShapeDtypeStruct((n_padded, 1), jnp.float32),
        grid_spec=pltpu.PrefetchScalarGridSpec(
            num_scalar_prefetch=0,
            grid=(num_blocks,),
            in_specs=[
                pl.BlockSpec((tile_rows, v), lambda i: (i, 0)),
                pl.BlockSpec((tile_rows, 1), lambda i: (i, 0)),
            ],
            out_specs=pl.BlockSpec((tile_rows, 1), lambda i: (i, 0)),
        ),
        compiler_params=pltpu.CompilerParams(
            dimension_semantics=("parallel",),
            vmem_limit_bytes=40 * 1024 * 1024),
    )(x_p, tgt2d)

    return jnp.sum(row_sums)


def _reference_loss(x, target, *, size, padding_idx, smoothing):
    # Pure-JAX reference mirroring the PyTorch module.
    n, v = x.shape
    confidence = 1.0 - smoothing
    col = jnp.arange(v)[None, :]
    tgt = target[:, None]
    td = jnp.where(col == tgt, confidence, smoothing / (size - 2))
    td = jnp.where(col == padding_idx, 0.0, td)
    td = jnp.where(tgt == padding_idx, 0.0, td)
    safe = jnp.where(td > 0, td, 1.0)
    return jnp.sum(jnp.where(td > 0, td * (jnp.log(safe) - x), 0.0))


if __name__ == "__main__":
    SIZE = 512         # vocab size
    PADDING_IDX = 0
    SMOOTHING = 0.1
    N = 300            # batch * seq rows (deliberately not a multiple of the tile)

    key = jax.random.PRNGKey(0)
    kx, kt = jax.random.split(key)
    logits = jax.random.normal(kx, (N, SIZE), dtype=jnp.float32)
    x = jax.nn.log_softmax(logits, axis=-1)
    target = jax.random.randint(kt, (N,), 0, SIZE, dtype=jnp.int32)
    # Make sure at least one row hits the padding index (tests the row zeroing).
    target = target.at[3].set(PADDING_IDX)

    # tile_rows=128 forces a multi-block parallel grid plus a padded tail block
    # at this small demo size; production use leaves tile_rows=None (auto).
    loss = label_smoothing_loss(x, target, size=SIZE, padding_idx=PADDING_IDX,
                                smoothing=SMOOTHING, tile_rows=128)
    loss = jax.block_until_ready(loss)

    ref = _reference_loss(x, target, size=SIZE, padding_idx=PADDING_IDX,
                          smoothing=SMOOTHING)
    assert jnp.allclose(loss, ref, rtol=1e-5, atol=1e-3), (loss, ref)

    print("KERNEL_OK")
</pallas_src>

<mosaic_0001>
module attributes {stable_mosaic.version = 11 : i64} {
  func.func @_label_smoothing_kernel(%arg0: i32, %arg1: memref<128x512xf32, #tpu.memory_space<vmem>>, %arg2: memref<128x1xi32, #tpu.memory_space<vmem>>, %arg3: memref<128x1xf32, #tpu.memory_space<vmem>>) attributes {dimension_semantics = [#tpu.dimension_semantics<parallel>], iteration_bounds = array<i64: 3>, scalar_prefetch = 0 : i64, scratch_operands = 0 : i64, tpu.core_type = #tpu.core_type<tc>, window_params = [{transform_indices = @transform_0, window_bounds = array<i64: 128, 512>}, {transform_indices = @transform_1, window_bounds = array<i64: 128, 1>}, {transform_indices = @transform_2, window_bounds = array<i64: 128, 1>}]} {
    %c0 = arith.constant 0 : index
    %c0_0 = arith.constant 0 : index
    %0 = vector.load %arg1[%c0, %c0_0] : memref<128x512xf32, #tpu.memory_space<vmem>>, vector<128x512xf32>
    %c0_1 = arith.constant 0 : index
    %c0_2 = arith.constant 0 : index
    %1 = vector.load %arg2[%c0_1, %c0_2] : memref<128x1xi32, #tpu.memory_space<vmem>>, vector<128x1xi32>
    %2 = tpu.iota {dimensions = array<i32: 1>} : vector<128x512xi32>
    %cst = arith.constant -0.105360515 : f32
    %3 = vector.broadcast %cst : f32 to vector<128x512xf32>
    %4 = arith.subf %3, %0 : vector<128x512xf32>
    %cst_3 = arith.constant 0.899999976 : f32
    %5 = vector.broadcast %cst_3 : f32 to vector<128x512xf32>
    %6 = arith.mulf %5, %4 : vector<128x512xf32>
    %cst_4 = arith.constant -8.53699588 : f32
    %7 = vector.broadcast %cst_4 : f32 to vector<128x512xf32>
    %8 = arith.subf %7, %0 : vector<128x512xf32>
    %cst_5 = arith.constant 1.96078428E-4 : f32
    %9 = vector.broadcast %cst_5 : f32 to vector<128x512xf32>
    %10 = arith.mulf %9, %8 : vector<128x512xf32>
    %11 = vector.broadcast %1 : vector<128x1xi32> to vector<128x512xi32>
    %12 = arith.cmpi eq, %2, %11 : vector<128x512xi32>
    %13 = arith.select %12, %6, %10 : vector<128x512xi1>, vector<128x512xf32>
    %c0_i32 = arith.constant 0 : i32
    %14 = vector.broadcast %c0_i32 : i32 to vector<128x512xi32>
    %15 = arith.cmpi eq, %2, %14 : vector<128x512xi32>
    %c0_i32_6 = arith.constant 0 : i32
    %16 = vector.broadcast %c0_i32_6 : i32 to vector<128x1xi32>
    %17 = arith.cmpi eq, %1, %16 : vector<128x1xi32>
    %18 = vector.broadcast %17 : vector<128x1xi1> to vector<128x512xi1>
    %19 = arith.ori %15, %18 : vector<128x512xi1>
    %cst_7 = arith.constant 0.000000e+00 : f32
    %20 = vector.broadcast %cst_7 : f32 to vector<128x512xf32>
    %21 = arith.select %19, %20, %13 : vector<128x512xi1>, vector<128x512xf32>
    %cst_8 = arith.constant dense<0.000000e+00> : vector<128xf32>
    %22 = vector.multi_reduction <add>, %21, %cst_8 [1] : vector<128x512xf32> to vector<128xf32>
    %23 = vector.shape_cast %22 : vector<128xf32> to vector<128x1xf32>
    %c0_9 = arith.constant 0 : index
    %c0_10 = arith.constant 0 : index
    %24 = vector.load %arg3[%c0_9, %c0_10] : memref<128x1xf32, #tpu.memory_space<vmem>>, vector<128x1xf32>
    tpu.vector_store %arg3[%c0_9, %c0_10], %23 {strides = array<i32>} : memref<128x1xf32, #tpu.memory_space<vmem>>, vector<128x1xf32>,
    return
  }
  func.func @transform_0(%arg0: i32) -> (i32, i32) {
    %c0_i32 = arith.constant 0 : i32
    %c0_i32_0 = arith.constant 0 : i32
    return %arg0, %c0_i32 : i32, i32
  }
  func.func @transform_1(%arg0: i32) -> (i32, i32) {
    %c0_i32 = arith.constant 0 : i32
    %c0_i32_0 = arith.constant 0 : i32
    return %arg0, %c0_i32 : i32, i32
  }
  func.func @transform_2(%arg0: i32) -> (i32, i32) {
    %c0_i32 = arith.constant 0 : i32
    %c0_i32_0 = arith.constant 0 : i32
    return %arg0, %c0_i32 : i32, i32
  }
}

</mosaic_0001>

<bundles_post_ra>
// kernel: tpu_custom_call.1
= control target key start
LH: loop header
LB: loop body
LE: loop exit
PB: predicated region body
PF: predicated region fallthrough
CT: control target
= control target key end

     0   :  { %7 = vsyncpa [#allocation3], 0  ;;  %s2480_s0 = inlined_call_operand.hbm [shape: f32[384,512], index: 0, kind: input, shape index: {}]   ;;  %s2481_s1 = inlined_call_operand.vmem [shape: s32[384,1], index: 1, kind: input, shape index: {}]   ;;  %s2482_s2 = inlined_call_operand.vmem [shape: f32[384,1], index: 2, kind: output, shape index: {}]  }
   0x1   :  { %9 = vsyncpa [#allocation3 + $0x1], 0  ;;  %s1255_s9 = smov 0   ;;  %s1257_s10 = smov 0  }
   0x2   :  { %s1259_s11 = smov 0   ;;  %s1261_s12 = smov 0  }
   0x3 LB: > { %s1110_s13 = sadd.s32 4294967295, %s1234_s12   ;;  %s1275_s14 = sadd.s32 1, %s1234_s12   ;;  %s1234_s12 = sphi %s1261_s12, %s2707_s12   ;;  %s1230_s11 = sphi %s1259_s11, %s2706_s11   ;;  %s1226_s10 = sphi %s1257_s10, %s2705_s10   ;;  %s1222_s9 = sphi %s1255_s9, %s2704_s9  }
   0x4   : > { %s19_s15 = ssub.s32 %s1234_s12, %s1275_s14  ;;  %s22_s16 = sadd.s32 1, %s1230_s11 }
   0x5   : > { %p20_p0 = scmp.eq.s32.totalorder %s19_s15, 0  ;;  %p29_p1 = scmp.ne.s32.totalorder %s1230_s11, %s1226_s10 }
   0x6   : > { %p30_p2 = scmp.eq.s32.totalorder %s1234_s12, 0  ;;  %p35_p3 = scmp.ne.s32.totalorder %s1226_s10, %s1222_s9 }
   0x7   : > { %s1285_s17 = scalar_select %p20_p0, %s1230_s11, %s22_s16  }
   0x8   : > { %p31_p4 = por %p30_p2, %p29_p1  ;;  %p36_p5 = scmp.eq.s32.totalorder %s1110_s13, 0 }
   0x9   : > { %p1134_p6 = scmp.lt.s32.totalorder %s1234_s12, 3  ;;  %s111_s19 = sand.u32 1, %s1230_s11  }
   0xa   : > { %p1290_p7 = por %p36_p5, %p35_p3  ;;  %s1114_s20 = sshll.u32 %s111_s19, 9 }
   0xb   : > { %s1127_s21 = sshll.u32 %s1234_s12, 13  ;;  %s115_s25 = scalar_lea.vmem [#allocation2], %s1114_s20 }
   0xc   : > { %s2486_s18 = scalar_select %p1290_p7, 1, 0 }
   0xd   : > { %s1299_s24 = scalar_lea.hbm %s2480_s0, %s1127_s21  ;;  %s123_s26 = sshll.u32 %s115_s25, 4  ;;  %s1301_s26 = int_to_ptr.vmem [resolvable:$true] %s123_s26 }
   0xe   : > { %p1303_p8 = pnand %p1134_p6, %p31_p4  ;;  %s1308_s28 = scalar_lea.sflag [#allocation3], %s111_s19 }
   0xf   : > { %s1172_s29 = scalar_lea.hbm %s1299_s24, 8192  ;;  %s1177_s4 = scalar_lea.hbm %s2480_s0, 24576 }
  0x10   : > { %p1173_p10 = scmp.ne.s32.totalorder %s1299_s24, %s1172_s29  ;;  %p1174_p11 = pneg %p1303_p8 }
  0x11   : > { %p1178_p0 = scmp.lt.s32.totalorder %s1299_s24, %s2480_s0  ;;  %p1179_p1 = scmp.lt.s32.totalorder %s1177_s4, %s1172_s29 }
  0x12   : > { %p1175_p12 = pnand %p1174_p11, %p1173_p10 }
  0x13   : > { %p1180_p2 = por %p1179_p1, %p1178_p0 }
  0x14   : > { %p1176_p13 = pneg %p1175_p12 }
  0x16   : > { %p1181_p3 = pnand %p1180_p2, %p1176_p13 }
  0x18   : > { %1184 = shalt.err (!%p1181_p3)
}
  0x19   : > { %s1185_s7 = scalar_lea.vmem %s1301_s26, 8192  ;;  %s1236_s8 = smov [#allocation2]  }
  0x1a   : > { %p1186_p4 = scmp.ne.s32.totalorder %s1301_s26, %s1185_s7  ;;  %s1190_s9 = sshll.u32 %s1236_s8, 4  ;;  %s1191_s9 = int_to_ptr.vmem [resolvable:$false] %s1190_s9 }
  0x1b   : > { %s1192_s15 = scalar_lea.vmem %s1191_s9, 16384  ;;  %p1193_p10 = scmp.lt.s32.totalorder %s1301_s26, %s1191_s9 }
  0x1c   : > { %p1188_p5 = pnand %p1186_p4, %p1174_p11  ;;  %p1194_p12 = scmp.lt.s32.totalorder %s1192_s15, %s1185_s7 }
  0x1e   : > { %p1189_p6 = pneg %p1188_p5  ;;  %p1195_p9 = por %p1194_p12, %p1193_p10 }
  0x20   : > { %p1196_p7 = pnand %p1195_p9, %p1189_p6 }
  0x22   : > { %1199 = shalt.err (!%p1196_p7)
}
  0x23   : > { %s1237_s16 = smov 512   ;;  %s1238_s19 = smov 32  }
  0x24   : > { %1133 = dma.hbm_to_vmem [thread:$0]  (!%p1303_p8), %s1299_s24, 8192, %s1301_s26, %s1308_s28, %s1237_s16, %s1237_s16, %s1238_s19  }
  0x25   : > { %p140_p11 = scmp.lt.s32.totalorder %s1234_s12, 4  ;;  %p2488_p13 = scmp.ge.s32.totalorder %s1234_s12, 1 }
  0x27   : > { %p141_p0 = pnand %p2488_p13, %p140_p11 }
  0x29   : > { %144 = sbr.rel (%p141_p0) target bundleno = 394 (0x18a), region = 28 }
  0x2e   : > { %s146_s20 = sand.u32 1, %s1226_s10   ;;  %p2489_p7 = scmp.ne.s32.totalorder %s2486_s18, 0 }
  0x2f   : > { %s1119_s21 = sshll.u32 %s146_s20, 9  ;;  %s147_s22 = scalar_lea.sflag [#allocation3], %s146_s20 }
  0x30   : > { %s1333_s23 = scalar_lea.vmem [#allocation2], %s1119_s21 }
  0x31   : > { %1217 = dma.done.wait (%p2489_p7), %s147_s22, 8192  }
  0x32   : > { %1219 = vsyncadd (%p2489_p7), %s147_s22, 4294959104  ;;  %s1120_s25 = sshll.u32 %s1110_s13, 4  ;;  %v1239_v0 = vmov 0   ;;  %v193_v15 = vld [vmem:[%s1333_s23 + $0x20] sm:$0xff]  ;;  %v194_v16 = vld [vmem:[%s1333_s23 + $0x28] sm:$0xff] }
  0x33   : > { %1171 = vset.pattern.permute.xlu1 %v1239_v0  ;;  %1170 = vset.pattern.permute.xlu0 %v1239_v0  ;;  %p178_p8 = scmp.lt.s32.totalorder %s1120_s25, 47  ;;  %v278_v22 = vsub.f32 -0.105360515, %v193_v15  ;;  %v189_v23 = vld [vmem:[%s1333_s23] sm:$0xff]  ;;  %v279_v27 = vsub.f32 -0.105360515, %v194_v16 }
  0x34   : > { %v190_v28 = vld [vmem:[%s1333_s23 + $0x8] sm:$0xff]  ;;  %v406_v31 = vsub.f32 -8.536996, %v193_v15  ;;  %v407_v32 = vsub.f32 -8.536996, %v194_v16  ;;  %v201_v35 = vld [vmem:[%s1333_s23 + $0x60] sm:$0xff] }
  0x35   : > { %s2709_s25 = smov (!%p178_p8, %s1120_s25), 47  ;;  %v274_v34 = vsub.f32 -0.105360515, %v189_v23  ;;  %v202_v36 = vld [vmem:[%s1333_s23 + $0x68] sm:$0xff]  ;;  %v1413_v37 = vmul.f32 0.9, %v278_v22 }
  0x36   : > { %s1121_s24 = sshll.u32 %s2709_s25, 3  ;;  %v275_v38 = vsub.f32 -0.105360515, %v190_v28  ;;  %v197_v39 = vld [vmem:[%s1333_s23 + $0x40] sm:$0xff]  ;;  %v198_v40 = vld [vmem:[%s1333_s23 + $0x48] sm:$0xff]  ;;  %v196_v22 = vld [vmem:[%s1333_s23 + $0x38] sm:$0xff] }
  0x37   : > { %s1351_s18 = scalar_lea.vmem %s2481_s1, %s1121_s24  ;;  %v1417_v41 = vmul.f32 0.9, %v279_v27  ;;  %v402_v42 = vsub.f32 -8.536996, %v189_v23  ;;  %v403_v43 = vsub.f32 -8.536996, %v190_v28  ;;  %s2433_s28 = scalar_lea.vmem %s2482_s2, %s1121_s24 }
  0x38   : > { %v255_v1 = vld [vmem:[%s1351_s18 + $0x10] sm:$0xff]  ;;  %v253_v2 = vld [vmem:[%s1351_s18] sm:$0xff]  ;;  %v256_v3 = vld [vmem:[%s1351_s18 + $0x18] sm:$0xff]  ;;  %v1419_v44 = vmul.f32 0.00019607843, %v406_v31 }
  0x39   : > { %537 = vperm.xlu1 %1171, %v255_v1   ;;  %531 = vperm.xlu0 %1170, %v253_v2   ;;  %v254_v4 = vld [vmem:[%s1351_s18 + $0x8] sm:$0xff]  ;;  %v257_v6 = vld [vmem:[%s1351_s18 + $0x20] sm:$0xff]  ;;  %v260_v7 = vld [vmem:[%s1351_s18 + $0x38] sm:$0xff]  ;;  %vm710_vm0 = vcmp.eq.s32.totalorder %v253_v2, 0  ;;  %vm713_vm2 = vcmp.eq.s32.totalorder %v256_v3, 0  ;;  %vm712_vm3 = vcmp.eq.s32.totalorder %v255_v1, 0 }
  0x3a   : > { %v258_v5 = vld [vmem:[%s1351_s18 + $0x28] sm:$0xff]  ;;  %v259_v8 = vld [vmem:[%s1351_s18 + $0x30] sm:$0xff]  ;;  %v1363_v10 = vld [vmem:[%s1351_s18 + $0x40] sm:$0xff]  ;;  %vm711_vm1 = vcmp.eq.s32.totalorder %v254_v4, 0  ;;  %vm714_vm5 = vcmp.eq.s32.totalorder %v257_v6, 0  ;;  %v726_v19 = vsel %vm710_vm0, 1, %v1239_v0 }
  0x3b   : > { %v262_v9 = vld [vmem:[%s1351_s18 + $0x48] sm:$0xff]  ;;  %v1367_v11 = vld [vmem:[%s1351_s18 + $0x58] sm:$0xff]  ;;  %v1370_v12 = vld [vmem:[%s1351_s18 + $0x50] sm:$0xff]  ;;  %vm715_vm4 = vcmp.eq.s32.totalorder %v258_v5, 0  ;;  %vm717_vm6 = vcmp.eq.s32.totalorder %v260_v7, 0  ;;  %vm716_vm7 = vcmp.eq.s32.totalorder %v259_v8, 0 }
  0x3c   : > { %v1375_v13 = vld [vmem:[%s1351_s18 + $0x68] sm:$0xff]  ;;  %v1378_v14 = vld [vmem:[%s1351_s18 + $0x60] sm:$0xff]  ;;  %v1385_v17 = vld [vmem:[%s1351_s18 + $0x78] sm:$0xff]  ;;  %v727_v20 = vsel %vm711_vm1, 1, %v1239_v0  ;;  %v729_v21 = vsel %vm713_vm2, 1, %v1239_v0  ;;  %vm719_vm8 = vcmp.eq.s32.totalorder %v262_v9, 0 }
  0x3d   : > { %540 = vperm.xlu1 %1171, %v256_v3   ;;  %534 = vperm.xlu0 %1170, %v254_v4   ;;  %v1388_v18 = vld [vmem:[%s1351_s18 + $0x70] sm:$0xff]  ;;  %v728_v24 = vsel %vm712_vm3, 1, %v1239_v0  ;;  %v731_v25 = vsel %vm715_vm4, 1, %v1239_v0  ;;  %v730_v26 = vsel %vm714_vm5, 1, %v1239_v0  ;;  %v1402_v29 = vsel %vm717_vm6, 1, %v1239_v0  ;;  %v209_v50 = vld [vmem:[%s1333_s23 + $0xa0] sm:$0xff] }
  0x3e   : > { %v1405_v30 = vsel %vm716_vm7, 1, %v1239_v0  ;;  %v1408_v33 = vsel %vm719_vm8, 1, %v1239_v0  ;;  %vm718_vm9 = vcmp.eq.s32.totalorder %v1363_v10, 0  ;;  %v1421_v45 = vmul.f32 0.00019607843, %v407_v32  ;;  %v210_v59 = vld [vmem:[%s1333_s23 + $0xa8] sm:$0xff] }
  0x3f   : > { %v286_v46 = vsub.f32 -0.105360515, %v201_v35  ;;  %v1423_v47 = vmul.f32 0.9, %v274_v34  ;;  %v287_v48 = vsub.f32 -0.105360515, %v202_v36 }
  0x40   : > { %v414_v49 = vsub.f32 -8.536996, %v201_v35  ;;  %v1426_v51 = vmul.f32 0.9, %v275_v38  ;;  %v415_v52 = vsub.f32 -8.536996, %v202_v36 }
  0x41   : > { %546 = vperm.xlu1 %1171, %v258_v5   ;;  %543 = vperm.xlu0 %1170, %v257_v6   ;;  %v282_v53 = vsub.f32 -0.105360515, %v197_v39  ;;  %v1428_v54 = vmul.f32 0.00019607843, %v402_v42  ;;  %v1430_v55 = vmul.f32 0.00019607843, %v403_v43 }
  0x42   : > { %v283_v56 = vsub.f32 -0.105360515, %v198_v40  ;;  %vm721_vm10 = vcmp.eq.s32.totalorder %v1367_v11, 0  ;;  %v1433_v57 = vmul.f32 0.9, %v286_v46  ;;  %v734_v3 = vsel %vm718_vm9, 1, %v1239_v0 }
  0x43   : > { %v410_v58 = vsub.f32 -8.536996, %v197_v39  ;;  %v1436_v60 = vmul.f32 0.9, %v287_v48  ;;  %v1438_v61 = vmul.f32 0.00019607843, %v414_v49 }
  0x44   : > { %v411_v62 = vsub.f32 -8.536996, %v198_v40  ;;  %v1440_v63 = vmul.f32 0.00019607843, %v415_v52  ;;  %v1442_v1 = vmul.f32 0.9, %v282_v53 }
  0x45   : > { %552 = vperm.xlu1 %1171, %v260_v7   ;;  %549 = vperm.xlu0 %1170, %v259_v8   ;;  %v294_v2 = vsub.f32 -0.105360515, %v209_v50  ;;  %v1447_v4 = vmul.f32 0.9, %v283_v56  ;;  %v295_v5 = vsub.f32 -0.105360515, %v210_v59 }
  0x46   : > { %v205_v6 = vld [vmem:[%s1333_s23 + $0x80] sm:$0xff]  ;;  %v737_v7 = vsel %vm721_vm10, 1, %v1239_v0  ;;  %v1453_v8 = vmul.f32 0.00019607843, %v410_v58  ;;  %v206_v15 = vld [vmem:[%s1333_s23 + $0x88] sm:$0xff]  ;;  %vm720_vm11 = vcmp.eq.s32.totalorder %v1370_v12, 0 }
  0x47   : > { %v1457_v16 = vmul.f32 0.00019607843, %v411_v62  ;;  %vm723_vm12 = vcmp.eq.s32.totalorder %v1375_v13, 0  ;;  %v291_v23 = vsub.f32 -0.105360515, %v206_v15  ;;  %v736_v28 = vsel %vm720_vm11, 1, %v1239_v0 }
  0x48   : > { %v281_v32 = vsub.f32 -0.105360515, %v196_v22  ;;  %v191_v34 = vld [vmem:[%s1333_s23 + $0x10] sm:$0xff]  ;;  %vm722_vm13 = vcmp.eq.s32.totalorder %v1378_v14, 0  ;;  %v192_v36 = vld [vmem:[%s1333_s23 + $0x18] sm:$0xff]  ;;  %v739_v43 = vsel %vm723_vm12, 1, %v1239_v0 }
  0x49   : > { %558 = vperm.xlu1 %1171, %v262_v9   ;;  %555 = vperm.xlu0 %1170, %v1363_v10   ;;  %v422_v9 = vsub.f32 -8.536996, %v209_v50  ;;  %v423_v10 = vsub.f32 -8.536996, %v210_v59  ;;  %v409_v39 = vsub.f32 -8.536996, %v196_v22 }
  0x4a   : > { %v276_v42 = vsub.f32 -0.105360515, %v191_v34  ;;  %v1492_v46 = vmul.f32 0.9, %v281_v32  ;;  %v277_v48 = vsub.f32 -0.105360515, %v192_v36 }
  0x4b   : > { %v1473_v31 = vmul.f32 0.00019607843, %v423_v10  ;;  %v217_v49 = vld [vmem:[%s1333_s23 + $0xe0] sm:$0xff]  ;;  %vm725_vm14 = vcmp.eq.s32.totalorder %v1385_v17, 0  ;;  %v218_v52 = vld [vmem:[%s1333_s23 + $0xe8] sm:$0xff]  ;;  %v738_v53 = vsel %vm722_vm13, 1, %v1239_v0 }
  0x4c   : > { %v1502_v56 = vmul.f32 0.00019607843, %v409_v39  ;;  %v405_v58 = vsub.f32 -8.536996, %v192_v36  ;;  %vm724_vm15 = vcmp.eq.s32.totalorder %v1388_v18, 0 }
  0x4d   : > { %564 = vperm.xlu1 %1171, %v1367_v11   ;;  %561 = vperm.xlu0 %1170, %v1370_v12   ;;  %v1464_v11 = vmul.f32 0.9, %v295_v5  ;;  %v1506_v59 = vmul.f32 0.9, %v276_v42  ;;  %v302_v62 = vsub.f32 -0.105360515, %v217_v49 }
  0x4e   : > { %v303_v5 = vsub.f32 -0.105360515, %v218_v52  ;;  %v1516_v10 = vmul.f32 0.00019607843, %v405_v58  ;;  %v740_v22 = vsel %vm724_vm15, 1, %v1239_v0  ;;  %v222_v58 = vld [vmem:[%s1333_s23 + $0x108] sm:$0xff] }
  0x51   : > { %570 = vperm.xlu1 %1171, %v1375_v13   ;;  %567 = vperm.xlu0 %1170, %v1378_v14   ;;  %v213_v13 = vld [vmem:[%s1333_s23 + $0xc0] sm:$0xff] }
  0x55   : > { %576 = vperm.xlu1 %1171, %v1385_v17   ;;  %573 = vperm.xlu0 %1170, %v1388_v18   ;;  %v225_v18 = vld [vmem:[%s1333_s23 + $0x120] sm:$0xff] }
  0x59   : > { %746 = vperm.xlu1 %1171, %v727_v20   ;;  %743 = vperm.xlu0 %1170, %v726_v19   ;;  %v195_v19 = vld [vmem:[%s1333_s23 + $0x30] sm:$0xff]  ;;  %v1461_v20 = vmul.f32 0.9, %v294_v2  ;;  %v214_v2 = vld [vmem:[%s1333_s23 + $0xc8] sm:$0xff] }
  0x5a   : > { %v280_v27 = vsub.f32 -0.105360515, %v195_v19 }
  0x5c   : > { %v1487_v40 = vmul.f32 0.9, %v280_v27  ;;  %v1525_v27 = vmul.f32 0.9, %v303_v5 }
  0x5d   : > { %752 = vperm.xlu1 %1171, %v729_v21   ;;  %749 = vperm.xlu0 %1170, %v728_v24   ;;  %v290_v21 = vsub.f32 -0.105360515, %v205_v6  ;;  %v418_v24 = vsub.f32 -8.536996, %v205_v6  ;;  %v430_v6 = vsub.f32 -8.536996, %v217_v49 }
  0x5e   : > { %2492 = vst [vmem:[#allocation7_spill] sm:$0xff] %v1525_v27 }
  0x5f   : > { %v1477_v35 = vmul.f32 0.9, %v290_v21  ;;  %v1482_v38 = vmul.f32 0.00019607843, %v418_v24  ;;  %v199_v21 = vld [vmem:[%s1333_s23 + $0x50] sm:$0xff] }
  0x60   : > { %v426_v24 = vsub.f32 -8.536996, %v213_v13  ;;  %v1527_v17 = vmul.f32 0.00019607843, %v430_v6  ;;  %v412_v42 = vsub.f32 -8.536996, %v199_v21 }
  0x61   : > { %758 = vperm.xlu1 %1171, %v731_v25   ;;  %755 = vperm.xlu0 %1170, %v730_v26   ;;  %v1468_v25 = vmul.f32 0.00019607843, %v422_v9  ;;  %v419_v26 = vsub.f32 -8.536996, %v206_v15  ;;  %v431_v9 = vsub.f32 -8.536996, %v218_v52 }
  0x62   : > { %v298_v15 = vsub.f32 -0.105360515, %v213_v13  ;;  %2493 = vst [vmem:[#allocation8_spill] sm:$0xff] %v1527_v17  ;;  %v1536_v39 = vmul.f32 0.00019607843, %v426_v24  ;;  %v208_v24 = vld [vmem:[%s1333_s23 + $0x98] sm:$0xff] }
  0x63   : > { %v1485_v12 = vmul.f32 0.00019607843, %v419_v26  ;;  %v200_v26 = vld [vmem:[%s1333_s23 + $0x58] sm:$0xff]  ;;  %v1529_v32 = vmul.f32 0.00019607843, %v431_v9 }
  0x64   : > { %2497 = vst [vmem:[#allocation12_spill] sm:$0xff] %v1536_v39  ;;  %v413_v49 = vsub.f32 -8.536996, %v200_v26  ;;  %v1547_v5 = vmul.f32 0.00019607843, %v412_v42 }
  0x65   : > { %764 = vperm.xlu1 %1171, %v1402_v29   ;;  %761 = vperm.xlu0 %1170, %v1405_v30   ;;  %v408_v29 = vsub.f32 -8.536996, %v195_v19  ;;  %v1480_v30 = vmul.f32 0.9, %v291_v23  ;;  %v299_v19 = vsub.f32 -0.105360515, %v214_v2 }
  0x66   : > { %v1522_v23 = vmul.f32 0.9, %v302_v62  ;;  %2494 = vst [vmem:[#allocation9_spill] sm:$0xff] %v1529_v32 }
  0x67   : > { %2490 = vst [vmem:[#allocation5_spill] sm:$0xff] %v1480_v30  ;;  %v1496_v50 = vmul.f32 0.00019607843, %v408_v29  ;;  %v284_v29 = vsub.f32 -0.105360515, %v199_v21 }
  0x68   : > { %2491 = vst [vmem:[#allocation6_spill] sm:$0xff] %v1522_v23  ;;  %v1533_v36 = vmul.f32 0.9, %v299_v19  ;;  %v207_v19 = vld [vmem:[%s1333_s23 + $0x90] sm:$0xff] }
  0x69   : > { %770 = vperm.xlu1 %1171, %v1408_v33   ;;  %767 = vperm.xlu0 %1170, %v734_v3   ;;  %v404_v33 = vsub.f32 -8.536996, %v191_v34  ;;  %v1509_v3 = vmul.f32 0.9, %v277_v48  ;;  %v1531_v34 = vmul.f32 0.9, %v298_v15 }
  0x6a   : > { %2496 = vst [vmem:[#allocation11_spill] sm:$0xff] %v1533_v36  ;;  %v1542_v52 = vmul.f32 0.9, %v284_v29  ;;  %v1549_v15 = vmul.f32 0.00019607843, %v413_v49  ;;  %v203_v36 = vld [vmem:[%s1333_s23 + $0x70] sm:$0xff] }
  0x6b   : > { %v1511_v14 = vmul.f32 0.00019607843, %v404_v33  ;;  %2495 = vst [vmem:[#allocation10_spill] sm:$0xff] %v1531_v34  ;;  %v221_v33 = vld [vmem:[%s1333_s23 + $0x100] sm:$0xff]  ;;  %v435_v29 = vsub.f32 -8.536996, %v222_v58 }
  0x6c   : > { %v306_v9 = vsub.f32 -0.105360515, %v221_v33  ;;  %v292_v42 = vsub.f32 -0.105360515, %v207_v19  ;;  %v293_v49 = vsub.f32 -0.105360515, %v208_v24 }
  0x6d   : > { %776 = vperm.xlu1 %1171, %v737_v7   ;;  %773 = vperm.xlu0 %1170, %v736_v28   ;;  %v741_v7 = vsel %vm725_vm14, 1, %v1239_v0  ;;  %v427_v28 = vsub.f32 -8.536996, %v214_v2  ;;  %v285_v0 = vsub.f32 -0.105360515, %v200_v26 }
  0x6e   : > { %v438_v2 = vsub.f32 -8.536996, %v225_v18 }
  0x6f   : > { %v1539_v48 = vmul.f32 0.00019607843, %v427_v28  ;;  %v1545_v13 = vmul.f32 0.9, %v285_v0 }
  0x70   : > { %v1557_v28 = vmul.f32 0.00019607843, %v438_v2  ;;  %v421_v2 = vsub.f32 -8.536996, %v208_v24  ;;  %v229_v24 = vld [vmem:[%s1333_s23 + $0x140] sm:$0xff] }
  0x71   : > { %782 = vperm.xlu1 %1171, %v739_v43   ;;  %779 = vperm.xlu0 %1170, %v738_v53   ;;  %v226_v43 = vld [vmem:[%s1333_s23 + $0x128] sm:$0xff]  ;;  %2498 = vst [vmem:[#allocation13_spill] sm:$0xff] %v1539_v48  ;;  %v310_v53 = vsub.f32 -0.105360515, %v225_v18  ;;  %v1561_v18 = vmul.f32 0.9, %v306_v9 }
  0x72   : > { %v311_v62 = vsub.f32 -0.105360515, %v226_v43  ;;  %v439_v6 = vsub.f32 -8.536996, %v226_v43  ;;  %2501 = vst [vmem:[#allocation16_spill] sm:$0xff] %v1557_v28  ;;  %v234_v9 = vld [vmem:[%s1333_s23 + $0x168] sm:$0xff] }
  0x73   : > { %v1552_v21 = vmul.f32 0.9, %v310_v53  ;;  %2503 = vst [vmem:[#allocation18_spill] sm:$0xff] %v1561_v18  ;;  %v1575_v18 = vmul.f32 0.9, %v293_v49 }
  0x74   : > { %v1555_v26 = vmul.f32 0.9, %v311_v62  ;;  %v1559_v0 = vmul.f32 0.00019607843, %v439_v6  ;;  %v1569_v62 = vmul.f32 0.00019607843, %v435_v29 }
  0x75   : > { %788 = vperm.xlu1 %1171, %v741_v7   ;;  %785 = vperm.xlu0 %1170, %v740_v22   ;;  %v307_v7 = vsub.f32 -0.105360515, %v222_v58  ;;  %2499 = vst [vmem:[#allocation14_spill] sm:$0xff] %v1552_v21  ;;  %v434_v22 = vsub.f32 -8.536996, %v221_v33  ;;  %v204_v21 = vld [vmem:[%s1333_s23 + $0x78] sm:$0xff] }
  0x76   : > { %2500 = vst [vmem:[#allocation15_spill] sm:$0xff] %v1555_v26  ;;  %2502 = vst [vmem:[#allocation17_spill] sm:$0xff] %v1559_v0  ;;  %v420_v33 = vsub.f32 -8.536996, %v207_v19  ;;  %v233_v26 = vld [vmem:[%s1333_s23 + $0x160] sm:$0xff] }
  0x77   : > { %v1563_v43 = vmul.f32 0.9, %v307_v7  ;;  %v1566_v53 = vmul.f32 0.00019607843, %v434_v22  ;;  %2506 = vst [vmem:[#allocation21_spill] sm:$0xff] %v1569_v62  ;;  %2508 = vst [vmem:[#allocation23_spill] sm:$0xff] %v1575_v18 }
  0x78   : > { %v1572_v58 = vmul.f32 0.9, %v292_v42  ;;  %v288_v6 = vsub.f32 -0.105360515, %v203_v36  ;;  %v289_v7 = vsub.f32 -0.105360515, %v204_v21 }
  0x79   : > { %2504 = vst [vmem:[#allocation19_spill] sm:$0xff] %v1563_v43  ;;  %2505 = vst [vmem:[#allocation20_spill] sm:$0xff] %v1566_v53  ;;  %v416_v43 = vsub.f32 -8.536996, %v203_v36  ;;  %v1577_v0 = vmul.f32 0.00019607843, %v420_v33 }
  0x7a   : > { %2507 = vst [vmem:[#allocation22_spill] sm:$0xff] %v1572_v58  ;;  %v417_v22 = vsub.f32 -8.536996, %v204_v21  ;;  %v318_v19 = vsub.f32 -0.105360515, %v233_v26  ;;  %v230_v42 = vld [vmem:[%s1333_s23 + $0x148] sm:$0xff] }
  0x7b   : > { %2509 = vst [vmem:[#allocation24_spill] sm:$0xff] %v1577_v0  ;;  %v1579_v53 = vmul.f32 0.00019607843, %v421_v2  ;;  %v319_v29 = vsub.f32 -0.105360515, %v234_v9 }
  0x7c   : > { %v446_v62 = vsub.f32 -8.536996, %v233_v26  ;;  %v447_v28 = vsub.f32 -8.536996, %v234_v9  ;;  %v1583_v48 = vmul.f32 0.9, %v288_v6 }
  0x7d   : > { %2510 = vst [vmem:[#allocation25_spill] sm:$0xff] %v1579_v53  ;;  %v1585_v49 = vmul.f32 0.9, %v289_v7  ;;  %v1587_v36 = vmul.f32 0.00019607843, %v416_v43  ;;  %v215_v26 = vld [vmem:[%s1333_s23 + $0xd0] sm:$0xff] }
  0x7e   : > { %v1589_v33 = vmul.f32 0.00019607843, %v417_v22  ;;  %v1591_v21 = vmul.f32 0.9, %v318_v19  ;;  %v314_v2 = vsub.f32 -0.105360515, %v229_v24 }
  0x7f   : > { %2511 = vst [vmem:[#allocation26_spill] sm:$0xff] %v1585_v49  ;;  %v1593_v34 = vmul.f32 0.9, %v319_v29  ;;  %v315_v39 = vsub.f32 -0.105360515, %v230_v42  ;;  %v216_v7 = vld [vmem:[%s1333_s23 + $0xd8] sm:$0xff] }
  0x80   : > { %2512 = vst [vmem:[#allocation27_spill] sm:$0xff] %v1589_v33  ;;  %2513 = vst [vmem:[#allocation28_spill] sm:$0xff] %v1591_v21  ;;  %v1596_v9 = vmul.f32 0.00019607843, %v446_v62  ;;  %v1598_v6 = vmul.f32 0.00019607843, %v447_v28 }
  0x81   : > { %2514 = vst [vmem:[#allocation29_spill] sm:$0xff] %v1593_v34  ;;  %v442_v27 = vsub.f32 -8.536996, %v229_v24  ;;  %v443_v32 = vsub.f32 -8.536996, %v230_v42  ;;  %v211_v43 = vld [vmem:[%s1333_s23 + $0xb0] sm:$0xff] }
  0x82   : > { %2515 = vst [vmem:[#allocation30_spill] sm:$0xff] %v1596_v9  ;;  %2516 = vst [vmem:[#allocation31_spill] sm:$0xff] %v1598_v6  ;;  %v1602_v23 = vmul.f32 0.9, %v314_v2  ;;  %v300_v22 = vsub.f32 -0.105360515, %v215_v26 }
  0x83   : > { %v212_v19 = vld [vmem:[%s1333_s23 + $0xb8] sm:$0xff]  ;;  %v1605_v21 = vmul.f32 0.9, %v315_v39  ;;  %v301_v29 = vsub.f32 -0.105360515, %v216_v7  ;;  %v241_v33 = vld [vmem:[%s1333_s23 + $0x1a0] sm:$0xff] }
  0x84   : > { %2517 = vst [vmem:[#allocation32_spill] sm:$0xff] %v1602_v23  ;;  %v428_v34 = vsub.f32 -8.536996, %v215_v26  ;;  %v429_v17 = vsub.f32 -8.536996, %v216_v7  ;;  %v242_v62 = vld [vmem:[%s1333_s23 + $0x1a8] sm:$0xff] }
  0x85   : > { %2518 = vst [vmem:[#allocation33_spill] sm:$0xff] %v1605_v21  ;;  %v296_v49 = vsub.f32 -0.105360515, %v211_v43  ;;  %v1609_v28 = vmul.f32 0.00019607843, %v442_v27 }
  0x86   : > { %v297_v6 = vsub.f32 -0.105360515, %v212_v19  ;;  %v424_v24 = vsub.f32 -8.536996, %v211_v43  ;;  %v1611_v42 = vmul.f32 0.00019607843, %v443_v32 }
  0x87   : > { %2519 = vst [vmem:[#allocation34_spill] sm:$0xff] %v1609_v28  ;;  %v1613_v2 = vmul.f32 0.9, %v300_v22  ;;  %v425_v23 = vsub.f32 -8.536996, %v212_v19  ;;  %v237_v43 = vld [vmem:[%s1333_s23 + $0x180] sm:$0xff] }
  0x88   : > { %2520 = vst [vmem:[#allocation35_spill] sm:$0xff] %v1611_v42  ;;  %v1615_v39 = vmul.f32 0.9, %v301_v29  ;;  %v326_v21 = vsub.f32 -0.105360515, %v241_v33  ;;  %v238_v22 = vld [vmem:[%s1333_s23 + $0x188] sm:$0xff] }
  0x89   : > { %2521 = vst [vmem:[#allocation36_spill] sm:$0xff] %v1613_v2  ;;  %v327_v26 = vsub.f32 -0.105360515, %v242_v62  ;;  %v1617_v7 = vmul.f32 0.00019607843, %v428_v34 }
  0x8a   : > { %2522 = vst [vmem:[#allocation37_spill] sm:$0xff] %v1615_v39  ;;  %v1619_v9 = vmul.f32 0.00019607843, %v429_v17  ;;  %v1621_v18 = vmul.f32 0.9, %v296_v49  ;;  %v223_v17 = vld [vmem:[%s1333_s23 + $0x110] sm:$0xff] }
  0x8b   : > { %2523 = vst [vmem:[#allocation38_spill] sm:$0xff] %v1617_v7  ;;  %v1623_v27 = vmul.f32 0.9, %v297_v6  ;;  %v1625_v32 = vmul.f32 0.00019607843, %v424_v24  ;;  %v219_v24 = vld [vmem:[%s1333_s23 + $0xf0] sm:$0xff] }
  0x8c   : > { %2524 = vst [vmem:[#allocation39_spill] sm:$0xff] %v1619_v9  ;;  %2525 = vst [vmem:[#allocation40_spill] sm:$0xff] %v1621_v18  ;;  %v1629_v19 = vmul.f32 0.00019607843, %v425_v23  ;;  %v454_v29 = vsub.f32 -8.536996, %v241_v33 }
  0x8d   : > { %2526 = vst [vmem:[#allocation41_spill] sm:$0xff] %v1623_v27  ;;  %2527 = vst [vmem:[#allocation42_spill] sm:$0xff] %v1625_v32  ;;  %v455_v42 = vsub.f32 -8.536996, %v242_v62  ;;  %v1631_v28 = vmul.f32 0.9, %v326_v21 }
  0x8e   : > { %2528 = vst [vmem:[#allocation43_spill] sm:$0xff] %v1629_v19  ;;  %v1633_v34 = vmul.f32 0.9, %v327_v26  ;;  %v322_v39 = vsub.f32 -0.105360515, %v237_v43  ;;  %v224_v9 = vld [vmem:[%s1333_s23 + $0x118] sm:$0xff] }
  0x8f   : > { %2529 = vst [vmem:[#allocation44_spill] sm:$0xff] %v1631_v28  ;;  %v323_v49 = vsub.f32 -0.105360515, %v238_v22  ;;  %v450_v2 = vsub.f32 -8.536996, %v237_v43  ;;  %v220_v21 = vld [vmem:[%s1333_s23 + $0xf8] sm:$0xff] }
  0x90   : > { %2530 = vst [vmem:[#allocation45_spill] sm:$0xff] %v1633_v34  ;;  %v451_v6 = vsub.f32 -8.536996, %v238_v22  ;;  %v1638_v27 = vmul.f32 0.00019607843, %v454_v29 }
  0x91   : > { %v1640_v23 = vmul.f32 0.00019607843, %v455_v42  ;;  %v308_v33 = vsub.f32 -0.105360515, %v223_v17  ;;  %v309_v19 = vsub.f32 -0.105360515, %v224_v9 }
  0x92   : > { %2531 = vst [vmem:[#allocation46_spill] sm:$0xff] %v1638_v27  ;;  %v436_v62 = vsub.f32 -8.536996, %v223_v17  ;;  %v1643_v28 = vmul.f32 0.9, %v322_v39  ;;  %v249_v42 = vld [vmem:[%s1333_s23 + $0x1e0] sm:$0xff] }
  0x93   : > { %2532 = vst [vmem:[#allocation47_spill] sm:$0xff] %v1640_v23  ;;  %v437_v26 = vsub.f32 -8.536996, %v224_v9  ;;  %v304_v34 = vsub.f32 -0.105360515, %v219_v24  ;;  %v250_v23 = vld [vmem:[%s1333_s23 + $0x1e8] sm:$0xff] }
  0x94   : > { %2533 = vst [vmem:[#allocation48_spill] sm:$0xff] %v1643_v28  ;;  %v1645_v7 = vmul.f32 0.9, %v323_v49  ;;  %v1647_v43 = vmul.f32 0.00019607843, %v450_v2 }
  0x95   : > { %v1649_v22 = vmul.f32 0.00019607843, %v451_v6  ;;  %v305_v29 = vsub.f32 -0.105360515, %v220_v21  ;;  %v432_v27 = vsub.f32 -8.536996, %v219_v24 }
  0x96   : > { %2534 = vst [vmem:[#allocation49_spill] sm:$0xff] %v1645_v7  ;;  %2535 = vst [vmem:[#allocation50_spill] sm:$0xff] %v1647_v43  ;;  %v1653_v18 = vmul.f32 0.9, %v308_v33  ;;  %v1655_v17 = vmul.f32 0.9, %v309_v19 }
  0x97   : > { %2536 = vst [vmem:[#allocation51_spill] sm:$0xff] %v1649_v22  ;;  %v1657_v9 = vmul.f32 0.00019607843, %v436_v62  ;;  %v1659_v39 = vmul.f32 0.00019607843, %v437_v26  ;;  %v245_v22 = vld [vmem:[%s1333_s23 + $0x1c0] sm:$0xff] }
  0x98   : > { %2537 = vst [vmem:[#allocation52_spill] sm:$0xff] %v1653_v18  ;;  %2538 = vst [vmem:[#allocation53_spill] sm:$0xff] %v1655_v17  ;;  %v1661_v49 = vmul.f32 0.9, %v304_v34  ;;  %v433_v2 = vsub.f32 -8.536996, %v220_v21 }
  0x99   : > { %2539 = vst [vmem:[#allocation54_spill] sm:$0xff] %v1657_v9  ;;  %2540 = vst [vmem:[#allocation55_spill] sm:$0xff] %v1659_v39  ;;  %v334_v6 = vsub.f32 -0.105360515, %v249_v42  ;;  %v335_v7 = vsub.f32 -0.105360515, %v250_v23  ;;  %v269_v39 = vlaneseq }
  0x9a   : > { %2541 = vst [vmem:[#allocation56_spill] sm:$0xff] %v1661_v49  ;;  %v1664_v28 = vmul.f32 0.9, %v305_v29  ;;  %v1666_v24 = vmul.f32 0.00019607843, %v432_v27  ;;  %v246_v43 = vld [vmem:[%s1333_s23 + $0x1c8] sm:$0xff] }
  0x9b   : > { %v462_v33 = vsub.f32 -8.536996, %v249_v42  ;;  %v463_v18 = vsub.f32 -8.536996, %v250_v23  ;;  %v231_v19 = vld [vmem:[%s1333_s23 + $0x150] sm:$0xff]  ;;  %v232_v26 = vld [vmem:[%s1333_s23 + $0x158] sm:$0xff] }
  0x9c   : > { %2542 = vst [vmem:[#allocation57_spill] sm:$0xff] %v1664_v28  ;;  %2543 = vst [vmem:[#allocation58_spill] sm:$0xff] %v1666_v24  ;;  %v1670_v17 = vmul.f32 0.00019607843, %v433_v2  ;;  %v330_v62 = vsub.f32 -0.105360515, %v245_v22 }
  0x9d   : > { %v1673_v34 = vmul.f32 0.9, %v334_v6  ;;  %v1675_v21 = vmul.f32 0.9, %v335_v7  ;;  %v331_v9 = vsub.f32 -0.105360515, %v246_v43 }
  0x9e   : > { %2544 = vst [vmem:[#allocation59_spill] sm:$0xff] %v1670_v17  ;;  %v458_v29 = vsub.f32 -8.536996, %v245_v22  ;;  %v459_v28 = vsub.f32 -8.536996, %v246_v43  ;;  %v227_v24 = vld [vmem:[%s1333_s23 + $0x130] sm:$0xff] }
  0x9f   : > { %2545 = vst [vmem:[#allocation60_spill] sm:$0xff] %v1673_v34  ;;  %2546 = vst [vmem:[#allocation61_spill] sm:$0xff] %v1675_v21  ;;  %v316_v27 = vsub.f32 -0.105360515, %v231_v19  ;;  %v1677_v49 = vmul.f32 0.00019607843, %v462_v33 }
  0xa0   : > { %v1679_v23 = vmul.f32 0.00019607843, %v463_v18  ;;  %v317_v42 = vsub.f32 -0.105360515, %v232_v26  ;;  %v1681_v2 = vmul.f32 0.9, %v330_v62 }
  0xa1   : > { %2547 = vst [vmem:[#allocation62_spill] sm:$0xff] %v1677_v49  ;;  %v444_v17 = vsub.f32 -8.536996, %v231_v19  ;;  %v1684_v32 = vand.u32 127, %v269_v39  ;;  %v1686_v7 = vmul.f32 0.9, %v331_v9 }
  0xa2   : > { %2548 = vst [vmem:[#allocation63_spill] sm:$0xff] %v1679_v23  ;;  %2549 = vst [vmem:[#allocation64_spill] sm:$0xff] %v1681_v2  ;;  %v445_v6 = vsub.f32 -8.536996, %v232_v26  ;;  %v228_v22 = vld [vmem:[%s1333_s23 + $0x138] sm:$0xff]  ;;  %v239_v2 = vld [vmem:[%s1333_s23 + $0x190] sm:$0xff] }
  0xa3   : > { %2550 = vst [vmem:[#allocation65_spill] sm:$0xff] %v1686_v7  ;;  %v1689_v43 = vmul.f32 0.00019607843, %v458_v29  ;;  %v1691_v33 = vmul.f32 0.00019607843, %v459_v28  ;;  %v240_v19 = vld [vmem:[%s1333_s23 + $0x198] sm:$0xff] }
  0xa4   : > { %v1693_v21 = vmul.f32 0.9, %v316_v27  ;;  %v1695_v18 = vmul.f32 0.9, %v317_v42  ;;  %v312_v62 = vsub.f32 -0.105360515, %v227_v24 }
  0xa5   : > { %2551 = vst [vmem:[#allocation66_spill] sm:$0xff] %v1689_v43  ;;  %2552 = vst [vmem:[#allocation67_spill] sm:$0xff] %v1691_v33  ;;  %v1699_v23 = vmul.f32 0.00019607843, %v444_v17  ;;  %v313_v39 = vsub.f32 -0.105360515, %v228_v22 }
  0xa6   : > { %2553 = vst [vmem:[#allocation68_spill] sm:$0xff] %v1693_v21  ;;  %2554 = vst [vmem:[#allocation69_spill] sm:$0xff] %v1695_v18  ;;  %v440_v34 = vsub.f32 -8.536996, %v227_v24  ;;  %v1701_v9 = vmul.f32 0.00019607843, %v445_v6 }
  0xa7   : > { %2555 = vst [vmem:[#allocation70_spill] sm:$0xff] %v1699_v23  ;;  %v441_v26 = vsub.f32 -8.536996, %v228_v22  ;;  %v235_v29 = vld [vmem:[%s1333_s23 + $0x170] sm:$0xff]  ;;  %v1705_v28 = vadd.s32 128, %v1684_v32  ;;  %v236_v42 = vld [vmem:[%s1333_s23 + $0x178] sm:$0xff] }
  0xa8   : > { %2556 = vst [vmem:[#allocation71_spill] sm:$0xff] %v1701_v9  ;;  %v324_v27 = vsub.f32 -0.105360515, %v239_v2  ;;  %v325_v7 = vsub.f32 -0.105360515, %v240_v19  ;;  %v247_v9 = vld [vmem:[%s1333_s23 + $0x1d0] sm:$0xff] }
  0xa9   : > { %v1708_v33 = vmul.f32 0.9, %v312_v62  ;;  %v452_v43 = vsub.f32 -8.536996, %v239_v2  ;;  %v453_v49 = vsub.f32 -8.536996, %v240_v19 }
  0xaa   : > { %v1710_v17 = vmul.f32 0.9, %v313_v39  ;;  %v1712_v24 = vmul.f32 0.00019607843, %v440_v34  ;;  %v320_v6 = vsub.f32 -0.105360515, %v235_v29 }
  0xab   : > { %2557 = vst [vmem:[#allocation72_spill] sm:$0xff] %v1708_v33  ;;  %v321_v18 = vsub.f32 -0.105360515, %v236_v42  ;;  %v448_v22 = vsub.f32 -8.536996, %v235_v29  ;;  %v248_v21 = vld [vmem:[%s1333_s23 + $0x1d8] sm:$0xff] }
  0xac   : > { %2558 = vst [vmem:[#allocation73_spill] sm:$0xff] %v1710_v17  ;;  %2559 = vst [vmem:[#allocation74_spill] sm:$0xff] %v1712_v24  ;;  %v1716_v23 = vmul.f32 0.00019607843, %v441_v26  ;;  %v1718_v53 = vmul.f32 0.9, %v324_v27 }
  0xad   : > { %v1720_v62 = vmul.f32 0.9, %v325_v7  ;;  %v1722_v2 = vmul.f32 0.00019607843, %v452_v43  ;;  %v1724_v19 = vmul.f32 0.00019607843, %v453_v49 }
  0xae   : > { %2560 = vst [vmem:[#allocation75_spill] sm:$0xff] %v1716_v23  ;;  %2561 = vst [vmem:[#allocation76_spill] sm:$0xff] %v1718_v53  ;;  %v449_v39 = vsub.f32 -8.536996, %v236_v42  ;;  %v332_v17 = vsub.f32 -0.105360515, %v247_v9 }
  0xaf   : > { %2562 = vst [vmem:[#allocation77_spill] sm:$0xff] %v1720_v62  ;;  %2563 = vst [vmem:[#allocation78_spill] sm:$0xff] %v1722_v2  ;;  %v333_v34 = vsub.f32 -0.105360515, %v248_v21  ;;  %v243_v33 = vld [vmem:[%s1333_s23 + $0x1b0] sm:$0xff]  ;;  %v244_v24 = vld [vmem:[%s1333_s23 + $0x1b8] sm:$0xff] }
  0xb0   : > { %2564 = vst [vmem:[#allocation79_spill] sm:$0xff] %v1724_v19  ;;  %v1728_v58 = vmul.f32 0.9, %v320_v6  ;;  %v1730_v29 = vmul.f32 0.9, %v321_v18  ;;  %v1735_v27 = vadd.s32 256, %v1684_v32 }
  0xb1   : > { %v1732_v26 = vmul.f32 0.00019607843, %v448_v22  ;;  %v460_v7 = vsub.f32 -8.536996, %v247_v9  ;;  %v461_v43 = vsub.f32 -8.536996, %v248_v21 }
  0xb2   : > { %2565 = vst [vmem:[#allocation80_spill] sm:$0xff] %v1728_v58  ;;  %2566 = vst [vmem:[#allocation81_spill] sm:$0xff] %v1730_v29  ;;  %v251_v62 = vld [vmem:[%s1333_s23 + $0x1f0] sm:$0xff]  ;;  %v328_v19 = vsub.f32 -0.105360515, %v243_v33  ;;  %v1747_v22 = vadd.s32 384, %v1684_v32 }
  0xb3   : > { %2567 = vst [vmem:[#allocation82_spill] sm:$0xff] %v1732_v26  ;;  %v329_v53 = vsub.f32 -0.105360515, %v244_v24  ;;  %v456_v2 = vsub.f32 -8.536996, %v243_v33  ;;  %v1750_v58 = vld [vmem:[%s1333_s23 + $0x1f8] sm:$0xff] }
  0xb4   : > { %v1738_v49 = vpop.permute.xlu1 %537  ;;  %v532_v42 = vpop.permute.xlu0 %531  ;;  %v1740_v23 = vmul.f32 0.00019607843, %v449_v39  ;;  %v1742_v6 = vmul.f32 0.9, %v332_v17  ;;  %v1744_v18 = vmul.f32 0.9, %v333_v34 }
  0xb5   : > { %v457_v29 = vsub.f32 -8.536996, %v244_v24  ;;  %2570 = vst [vmem:[#allocation85_spill] sm:$0xff] %v1750_v58  ;;  %v336_v21 = vsub.f32 -0.105360515, %v251_v62  ;;  %vm586_vm0 = vcmp.eq.s32.totalorder %v1684_v32, %v1738_v49  ;;  %vm578_vm1 = vcmp.eq.s32.totalorder %v1684_v32, %v532_v42  ;;  %v2626_v58 = vld [vmem:[#allocation29_spill] sm:$0xff] }
  0xb6   : > { %2568 = vst [vmem:[#allocation83_spill] sm:$0xff] %v1742_v6  ;;  %2569 = vst [vmem:[#allocation84_spill] sm:$0xff] %v1744_v18  ;;  %v1752_v9 = vmul.f32 0.00019607843, %v460_v7  ;;  %v1754_v26 = vmul.f32 0.00019607843, %v461_v43  ;;  %vm579_vm2 = vcmp.eq.s32.totalorder %v1705_v28, %v532_v42  ;;  %vm587_vm3 = vcmp.eq.s32.totalorder %v1705_v28, %v1738_v49 }
  0xb7   : > { %v464_v0 = vsub.f32 -8.536996, %v251_v62  ;;  %v1758_v39 = vmul.f32 0.9, %v328_v19  ;;  %v1760_v17 = vmul.f32 0.9, %v329_v53  ;;  %vm580_vm4 = vcmp.eq.s32.totalorder %v1735_v27, %v532_v42 }
  0xb8   : > { %2571 = vst [vmem:[#allocation86_spill] sm:$0xff] %v1752_v9  ;;  %2572 = vst [vmem:[#allocation87_spill] sm:$0xff] %v1754_v26  ;;  %v1756_v30 = vpop.permute.xlu1 %540  ;;  %v535_v33 = vpop.permute.xlu0 %534  ;;  %v1762_v34 = vmul.f32 0.00019607843, %v456_v2  ;;  %v1769_v7 = vmul.f32 0.00019607843, %v457_v29  ;;  %vm581_vm5 = vcmp.eq.s32.totalorder %v1747_v22, %v532_v42  ;;  %vm588_vm6 = vcmp.eq.s32.totalorder %v1735_v27, %v1738_v49 }
  0xb9   : > { %2573 = vst [vmem:[#allocation88_spill] sm:$0xff] %v1760_v17  ;;  %v1771_v62 = vmul.f32 0.9, %v336_v21  ;;  %v1778_v53 = vmul.f32 0.00019607843, %v464_v0  ;;  %v1786_v43 = vsel %vm578_vm1, %v1423_v47, %v1428_v54  ;;  %v1790_v21 = vsel %vm579_vm2, %v1426_v51, %v1430_v55  ;;  %v2589_v42 = vld [vmem:[#allocation7_spill] sm:$0xff] }
  0xba   : > { %2574 = vst [vmem:[#allocation89_spill] sm:$0xff] %v1769_v7  ;;  %v1797_v0 = vsel %vm586_vm0, %v1442_v1, %v1453_v8  ;;  %vm590_vm7 = vcmp.eq.s32.totalorder %v1684_v32, %v1756_v30  ;;  %vm591_vm8 = vcmp.eq.s32.totalorder %v1705_v28, %v1756_v30  ;;  %vm582_vm9 = vcmp.eq.s32.totalorder %v1684_v32, %v535_v33  ;;  %v2606_v19 = vld [vmem:[#allocation20_spill] sm:$0xff]  ;;  %v2625_v7 = vld [vmem:[#allocation31_spill] sm:$0xff] }
  0xbb   : > { %2575 = vst [vmem:[#allocation90_spill] sm:$0xff] %v1771_v62  ;;  %2576 = vst [vmem:[#allocation91_spill] sm:$0xff] %v1778_v53  ;;  %vm583_vm10 = vcmp.eq.s32.totalorder %v1705_v28, %v535_v33  ;;  %v1807_v47 = vsel %vm587_vm3, %v1447_v4, %v1457_v16  ;;  %v1811_v51 = vsel %vm580_vm4, %v1506_v59, %v1511_v14  ;;  %v2608_v62 = vld [vmem:[#allocation21_spill] sm:$0xff]  ;;  %v2609_v53 = vld [vmem:[#allocation19_spill] sm:$0xff] }
  0xbc   : > { %v1782_v2 = vpop.permute.xlu1 %546  ;;  %v544_v29 = vpop.permute.xlu0 %543  ;;  %v1815_v54 = vsel %vm581_vm5, %v1509_v3, %v1516_v10  ;;  %vm589_vm11 = vcmp.eq.s32.totalorder %v1747_v22, %v1738_v49  ;;  %vm592_vm12 = vcmp.eq.s32.totalorder %v1735_v27, %v1756_v30  ;;  %vm584_vm13 = vcmp.eq.s32.totalorder %v1735_v27, %v535_v33  ;;  %v2584_v10 = vld [vmem:[#allocation42_spill] sm:$0xff]  ;;  %v2588_v49 = vld [vmem:[#allocation9_spill] sm:$0xff]  ;;  %v2629_v26 = vld [vmem:[#allocation32_spill] sm:$0xff] }
  0xbd   : > { %vm585_vm14 = vcmp.eq.s32.totalorder %v1747_v22, %v535_v33  ;;  %v1828_v55 = vsel %vm588_vm6, %v1542_v52, %v1547_v5  ;;  %v1834_v8 = vsel %vm582_vm9, %v1413_v37, %v1419_v44  ;;  %v1838_v16 = vsel %vm583_vm10, %v1417_v41, %v1421_v45  ;;  %v2586_v5 = vld [vmem:[#allocation8_spill] sm:$0xff]  ;;  %v2631_v9 = vld [vmem:[#allocation35_spill] sm:$0xff] }
  0xbe   : > { %v1845_v59 = vsel %vm590_vm7, %v1433_v57, %v1438_v61  ;;  %v1852_v3 = vsel %vm591_vm8, %v1436_v60, %v1440_v63  ;;  %vm598_vm15 = vcmp.eq.s32.totalorder %v1684_v32, %v1782_v2  ;;  %vm599_vm0 = vcmp.eq.s32.totalorder %v1705_v28, %v1782_v2 }
  0xbf   : > { %vm594_vm1 = vcmp.eq.s32.totalorder %v1684_v32, %v544_v29  ;;  %vm595_vm2 = vcmp.eq.s32.totalorder %v1705_v28, %v544_v29  ;;  %v1862_v37 = vsel %vm584_vm13, %v1487_v40, %v1496_v50  ;;  %v1866_v41 = vsel %vm585_vm14, %v1492_v46, %v1502_v56  ;;  %v2577_v46 = vld [vmem:[#allocation5_spill] sm:$0xff]  ;;  %v2583_v56 = vld [vmem:[#allocation26_spill] sm:$0xff] }
  0xc0   : > { %v1830_v1 = vpop.permute.xlu1 %552  ;;  %v550_v4 = vpop.permute.xlu0 %549  ;;  %v1873_v44 = vsel %vm589_vm11, %v1545_v13, %v1549_v15  ;;  %vm593_vm3 = vcmp.eq.s32.totalorder %v1747_v22, %v1756_v30  ;;  %vm600_vm4 = vcmp.eq.s32.totalorder %v1735_v27, %v1782_v2  ;;  %vm596_vm5 = vcmp.eq.s32.totalorder %v1735_v27, %v544_v29  ;;  %v2587_v15 = vld [vmem:[#allocation6_spill] sm:$0xff] }
  0xc1   : > { %vm597_vm6 = vcmp.eq.s32.totalorder %v1747_v22, %v544_v29  ;;  %v1886_v45 = vsel %vm592_vm12, %v1583_v48, %v1587_v36  ;;  %v1892_v61 = vsel %vm598_vm15, %v1461_v20, %v1468_v25  ;;  %v1896_v63 = vsel %vm599_vm0, %v1464_v11, %v1473_v31  ;;  %v2578_v20 = vld [vmem:[#allocation24_spill] sm:$0xff]  ;;  %v2579_v11 = vld [vmem:[#allocation22_spill] sm:$0xff]  ;;  %v2580_v31 = vld [vmem:[#allocation25_spill] sm:$0xff] }
  0xc2   : > { %v1900_v40 = vsel %vm594_vm1, %v1477_v35, %v1482_v38  ;;  %v1904_v50 = vsel %vm595_vm2, %v2577_v46, %v1485_v12  ;;  %vm606_vm7 = vcmp.eq.s32.totalorder %v1684_v32, %v1830_v1  ;;  %vm607_vm8 = vcmp.eq.s32.totalorder %v1705_v28, %v1830_v1  ;;  %v2581_v35 = vld [vmem:[#allocation23_spill] sm:$0xff]  ;;  %v2585_v48 = vld [vmem:[#allocation40_spill] sm:$0xff] }
  0xc3   : > { %vm602_vm9 = vcmp.eq.s32.totalorder %v1684_v32, %v550_v4  ;;  %vm603_vm10 = vcmp.eq.s32.totalorder %v1705_v28, %v550_v4  ;;  %v1914_v25 = vsel %vm596_vm5, %v2579_v11, %v2578_v20  ;;  %v1918_v38 = vsel %vm597_vm6, %v2581_v35, %v2580_v31  ;;  %v2582_v12 = vld [vmem:[#allocation27_spill] sm:$0xff]  ;;  %v2590_v29 = vld [vmem:[#allocation12_spill] sm:$0xff]  ;;  %v2592_v20 = vld [vmem:[#allocation13_spill] sm:$0xff] }
  0xc4   : > { %v1888_v57 = vpop.permute.xlu1 %558  ;;  %v556_v60 = vpop.permute.xlu0 %555  ;;  %v1925_v14 = vsel %vm593_vm3, %v2583_v56, %v2582_v12  ;;  %vm601_vm11 = vcmp.eq.s32.totalorder %v1747_v22, %v1782_v2  ;;  %vm608_vm12 = vcmp.eq.s32.totalorder %v1735_v27, %v1830_v1  ;;  %vm604_vm13 = vcmp.eq.s32.totalorder %v1735_v27, %v550_v4  ;;  %v2593_v11 = vld [vmem:[#allocation11_spill] sm:$0xff]  ;;  %v2594_v35 = vld [vmem:[#allocation38_spill] sm:$0xff]  ;;  %v2595_v12 = vld [vmem:[#allocation36_spill] sm:$0xff] }
  0xc5   : > { %vm605_vm14 = vcmp.eq.s32.totalorder %v1747_v22, %v550_v4  ;;  %v1938_v52 = vsel %vm600_vm4, %v2585_v48, %v2584_v10  ;;  %v1944_v36 = vsel %vm606_vm7, %v2587_v15, %v2586_v5  ;;  %v1948_v33 = vsel %vm607_vm8, %v2589_v42, %v2588_v49  ;;  %v2591_v4 = vld [vmem:[#allocation10_spill] sm:$0xff]  ;;  %v2596_v10 = vld [vmem:[#allocation39_spill] sm:$0xff]  ;;  %v2597_v48 = vld [vmem:[#allocation37_spill] sm:$0xff] }
  0xc6   : > { %v1952_v46 = vsel %vm602_vm9, %v2591_v4, %v2590_v29  ;;  %v1956_v31 = vsel %vm603_vm10, %v2593_v11, %v2592_v20  ;;  %vm614_vm15 = vcmp.eq.s32.totalorder %v1684_v32, %v1888_v57  ;;  %vm615_vm0 = vcmp.eq.s32.totalorder %v1705_v28, %v1888_v57  ;;  %v2598_v15 = vld [vmem:[#allocation43_spill] sm:$0xff]  ;;  %v2599_v49 = vld [vmem:[#allocation41_spill] sm:$0xff]  ;;  %v2600_v29 = vld [vmem:[#allocation58_spill] sm:$0xff] }
  0xc7   : > { %vm610_vm1 = vcmp.eq.s32.totalorder %v1684_v32, %v556_v60  ;;  %vm611_vm2 = vcmp.eq.s32.totalorder %v1705_v28, %v556_v60  ;;  %v1966_v56 = vsel %vm604_vm13, %v2595_v12, %v2594_v35  ;;  %v1970_v5 = vsel %vm605_vm14, %v2597_v48, %v2596_v10  ;;  %v2601_v4 = vld [vmem:[#allocation56_spill] sm:$0xff]  ;;  %v2603_v12 = vld [vmem:[#allocation14_spill] sm:$0xff]  ;;  %v2604_v48 = vld [vmem:[#allocation17_spill] sm:$0xff] }
  0xc8   : > { %v1940_v30 = vpop.permute.xlu1 %564  ;;  %v562_v13 = vpop.permute.xlu0 %561  ;;  %v1977_v42 = vsel %vm601_vm11, %v2599_v49, %v2598_v15  ;;  %vm609_vm3 = vcmp.eq.s32.totalorder %v1747_v22, %v1830_v1  ;;  %vm616_vm4 = vcmp.eq.s32.totalorder %v1735_v27, %v1888_v57  ;;  %vm612_vm5 = vcmp.eq.s32.totalorder %v1735_v27, %v556_v60  ;;  %v2602_v35 = vld [vmem:[#allocation16_spill] sm:$0xff]  ;;  %v2605_v15 = vld [vmem:[#allocation15_spill] sm:$0xff] }
  0xc9   : > { %vm706_vm6 = vcmp.eq.s32.totalorder %v1684_v32, 0  ;;  %vm613_vm7 = vcmp.eq.s32.totalorder %v1747_v22, %v556_v60  ;;  %v1991_v2 = vsel %vm608_vm12, %v2601_v4, %v2600_v29  ;;  %v1997_v10 = vsel %vm614_vm15, %v2603_v12, %v2602_v35  ;;  %v2607_v60 = vld [vmem:[#allocation18_spill] sm:$0xff]  ;;  %v2611_v4 = vld [vmem:[#allocation52_spill] sm:$0xff]  ;;  %v2614_v12 = vld [vmem:[#allocation53_spill] sm:$0xff] }
  0xca   : > { %v2001_v49 = vsel %vm615_vm0, %v2605_v15, %v2604_v48  ;;  %v2005_v24 = vsel %vm610_vm1, %v2607_v60, %v2606_v19  ;;  %v2009_v17 = vsel %vm611_vm2, %v2609_v53, %v2608_v62  ;;  %vm622_vm8 = vcmp.eq.s32.totalorder %v1684_v32, %v1940_v30  ;;  %v2610_v29 = vld [vmem:[#allocation54_spill] sm:$0xff]  ;;  %v2613_v19 = vld [vmem:[#allocation55_spill] sm:$0xff]  ;;  %v2617_v53 = vld [vmem:[#allocation57_spill] sm:$0xff] }
  0xcb   : > { %vm623_vm9 = vcmp.eq.s32.totalorder %v1705_v28, %v1940_v30  ;;  %vm618_vm10 = vcmp.eq.s32.totalorder %v1684_v32, %v562_v13  ;;  %vm619_vm11 = vcmp.eq.s32.totalorder %v1705_v28, %v562_v13  ;;  %v2019_v35 = vsel %vm612_vm5, %v2611_v4, %v2610_v29  ;;  %v2616_v62 = vld [vmem:[#allocation59_spill] sm:$0xff]  ;;  %v2619_v60 = vld [vmem:[#allocation74_spill] sm:$0xff]  ;;  %v2620_v29 = vld [vmem:[#allocation72_spill] sm:$0xff] }
  0xcc   : > { %v1993_v20 = vpop.permute.xlu1 %570  ;;  %v568_v11 = vpop.permute.xlu0 %567  ;;  %2612 = vst [vmem:[#allocation5_spill] sm:$0xff] %v2019_v35  ;;  %v2023_v48 = vsel %vm613_vm7, %v2614_v12, %v2613_v19  ;;  %v2030_v15 = vsel %vm609_vm3, %v2617_v53, %v2616_v62  ;;  %vm617_vm12 = vcmp.eq.s32.totalorder %v1747_v22, %v1888_v57  ;;  %vm624_vm13 = vcmp.eq.s32.totalorder %v1735_v27, %v1940_v30  ;;  %v2622_v12 = vld [vmem:[#allocation30_spill] sm:$0xff]  ;;  %v2623_v62 = vld [vmem:[#allocation28_spill] sm:$0xff]  ;;  %v2651_v35 = vld [vmem:[#allocation51_spill] sm:$0xff] }
  0xcd   : > { %2615 = vst [vmem:[#allocation24_spill] sm:$0xff] %v2023_v48  ;;  %2618 = vst [vmem:[#allocation22_spill] sm:$0xff] %v2030_v15  ;;  %vm620_vm14 = vcmp.eq.s32.totalorder %v1735_v27, %v562_v13  ;;  %vm621_vm15 = vcmp.eq.s32.totalorder %v1747_v22, %v562_v13  ;;  %v2043_v4 = vsel %vm616_vm4, %v2620_v29, %v2619_v60  ;;  %v2628_v13 = vld [vmem:[#allocation34_spill] sm:$0xff]  ;;  %v2632_v48 = vld [vmem:[#allocation33_spill] sm:$0xff] }
  0xce   : > { %2621 = vst [vmem:[#allocation25_spill] sm:$0xff] %v2043_v4  ;;  %v2051_v53 = vsel %vm622_vm8, %v2623_v62, %v2622_v12  ;;  %v2055_v18 = vsel %vm623_vm9, %v2626_v58, %v2625_v7  ;;  %v2059_v6 = vsel %vm618_vm10, %v2629_v26, %v2628_v13  ;;  %v2063_v60 = vsel %vm619_vm11, %v2632_v48, %v2631_v9  ;;  %v2634_v58 = vld [vmem:[#allocation70_spill] sm:$0xff]  ;;  %v2635_v7 = vld [vmem:[#allocation68_spill] sm:$0xff]  ;;  %v2637_v29 = vld [vmem:[#allocation71_spill] sm:$0xff] }
  0xcf   : > { %2624 = vst [vmem:[#allocation23_spill] sm:$0xff] %v2051_v53  ;;  %2627 = vst [vmem:[#allocation27_spill] sm:$0xff] %v2055_v18  ;;  %vm630_vm0 = vcmp.eq.s32.totalorder %v1684_v32, %v1993_v20  ;;  %vm631_vm1 = vcmp.eq.s32.totalorder %v1705_v28, %v1993_v20  ;;  %vm626_vm2 = vcmp.eq.s32.totalorder %v1684_v32, %v568_v11  ;;  %v2638_v12 = vld [vmem:[#allocation69_spill] sm:$0xff]  ;;  %v2640_v48 = vld [vmem:[#allocation75_spill] sm:$0xff] }
  0xd0   : > { %v2045_v1 = vpop.permute.xlu1 %576  ;;  %v2047_v19 = vpop.permute.xlu0 %573  ;;  %2630 = vst [vmem:[#allocation26_spill] sm:$0xff] %v2059_v6  ;;  %2633 = vst [vmem:[#allocation42_spill] sm:$0xff] %v2063_v60  ;;  %vm627_vm3 = vcmp.eq.s32.totalorder %v1705_v28, %v568_v11  ;;  %vm628_vm4 = vcmp.eq.s32.totalorder %v1735_v27, %v568_v11  ;;  %v2074_v26 = vsel %vm620_vm14, %v2635_v7, %v2634_v58  ;;  %v2641_v62 = vld [vmem:[#allocation73_spill] sm:$0xff]  ;;  %v2643_v58 = vld [vmem:[#allocation82_spill] sm:$0xff] }
  0xd1   : > { %2636 = vst [vmem:[#allocation40_spill] sm:$0xff] %v2074_v26  ;;  %v2078_v9 = vsel %vm621_vm15, %v2638_v12, %v2637_v29  ;;  %v2085_v13 = vsel %vm617_vm12, %v2641_v62, %v2640_v48  ;;  %vm632_vm5 = vcmp.eq.s32.totalorder %v1735_v27, %v1993_v20  ;;  %vm629_vm7 = vcmp.eq.s32.totalorder %v1747_v22, %v568_v11  ;;  %v2644_v7 = vld [vmem:[#allocation80_spill] sm:$0xff]  ;;  %v2645_v57 = vld [vmem:[#allocation46_spill] sm:$0xff]  ;;  %v2648_v26 = vld [vmem:[#allocation45_spill] sm:$0xff] }
  0xd2   : > { %2639 = vst [vmem:[#allocation8_spill] sm:$0xff] %v2078_v9  ;;  %2642 = vst [vmem:[#allocation6_spill] sm:$0xff] %v2085_v13  ;;  %vm625_vm8 = vcmp.eq.s32.totalorder %v1747_v22, %v1940_v30  ;;  %v2097_v29 = vsel %vm624_vm13, %v2644_v7, %v2643_v58  ;;  %v2646_v48 = vld [vmem:[#allocation44_spill] sm:$0xff]  ;;  %v2647_v13 = vld [vmem:[#allocation47_spill] sm:$0xff]  ;;  %vm638_vm9 = vcmp.eq.s32.totalorder %v1684_v32, %v2045_v1 }
  0xd3   : > { %v2101_v62 = vsel %vm630_vm0, %v2646_v48, %v2645_v57  ;;  %v2105_v6 = vsel %vm631_vm1, %v2648_v26, %v2647_v13  ;;  %v2649_v4 = vld [vmem:[#allocation50_spill] sm:$0xff]  ;;  %v2650_v53 = vld [vmem:[#allocation48_spill] sm:$0xff]  ;;  %v2652_v60 = vld [vmem:[#allocation49_spill] sm:$0xff]  ;;  %vm639_vm13 = vcmp.eq.s32.totalorder %v1705_v28, %v2045_v1  ;;  %vm634_vm14 = vcmp.eq.s32.totalorder %v1684_v32, %v2047_v19 }
  0xd4   : > { %v747_v12 = vpop.permute.xlu1 %746  ;;  %v744_v9 = vpop.permute.xlu0 %743  ;;  %v2109_v15 = vsel %vm626_vm2, %v2650_v53, %v2649_v4  ;;  %v2113_v18 = vsel %vm627_vm3, %v2652_v60, %v2651_v35  ;;  %v2653_v58 = vld [vmem:[#allocation78_spill] sm:$0xff]  ;;  %v2654_v7 = vld [vmem:[#allocation76_spill] sm:$0xff]  ;;  %v2655_v53 = vld [vmem:[#allocation79_spill] sm:$0xff]  ;;  %vm635_vm0 = vcmp.eq.s32.totalorder %v1705_v28, %v2047_v19 }
  0xd5   : > { %vm791_vm10 = vcmp.eq.s32.totalorder %v747_v12, 1  ;;  %vm790_vm11 = vcmp.eq.s32.totalorder %v744_v9, 1  ;;  %v2121_v57 = vsel %vm628_vm4, %v2654_v7, %v2653_v58  ;;  %v2656_v60 = vld [vmem:[#allocation77_spill] sm:$0xff]  ;;  %v2659_v7 = vld [vmem:[#allocation60_spill] sm:$0xff]  ;;  %v2664_v9 = vld [vmem:[#allocation66_spill] sm:$0xff] }
  0xd6   : > { %vm810_vm12 = vmor %vm706_vm6, %vm791_vm10  ;;  %v875_v4 = vsel %vm791_vm10, 0.0, %v1838_v16  ;;  %v871_v35 = vsel %vm790_vm11, 0.0, %v1790_v21  ;;  %v2134_v26 = vsel %vm629_vm7, %v2656_v60, %v2655_v53  ;;  %v2657_v13 = vld [vmem:[#allocation81_spill] sm:$0xff]  ;;  %v2156_v16 = vsel %vm632_vm5, %v1758_v39, %v1762_v34  ;;  %v2680_v28 = vld [vmem:[#allocation23_spill] sm:$0xff] }
  0xd7   : > { %v2141_v48 = vsel %vm625_vm8, %v2657_v13, %v1740_v23  ;;  %v874_v21 = vsel %vm810_vm12, 0.0, %v1834_v8  ;;  %vm806_vm15 = vmor %vm706_vm6, %vm790_vm11  ;;  %v2658_v8 = vld [vmem:[#allocation62_spill] sm:$0xff]  ;;  %v876_v39 = vsel %vm791_vm10, 0.0, %v1862_v37  ;;  %v872_v13 = vsel %vm790_vm11, 0.0, %v1811_v51 }
  0xd8   : > { %v870_v23 = vsel %vm806_vm15, 0.0, %v1786_v43  ;;  %v753_v30 = vpop.permute.xlu1 %752  ;;  %v750_v11 = vpop.permute.xlu0 %749  ;;  %v939_v58 = vadd.f32 %v875_v4, %v874_v21  ;;  %v2166_v53 = vsel %vm638_vm9, %v2659_v7, %v2658_v8  ;;  %v877_v37 = vsel %vm791_vm10, 0.0, %v1866_v41  ;;  %v2661_v8 = vld [vmem:[#allocation61_spill] sm:$0xff] }
  0xd9   : > { %vm793_vm1 = vcmp.eq.s32.totalorder %v753_v30, 1  ;;  %vm792_vm2 = vcmp.eq.s32.totalorder %v750_v11, 1  ;;  %v934_v34 = vadd.f32 %v871_v35, %v870_v23  ;;  %v2660_v23 = vld [vmem:[#allocation63_spill] sm:$0xff]  ;;  %v873_v7 = vsel %vm790_vm11, 0.0, %v1815_v54 }
  0xda   : > { %vm818_vm3 = vmor %vm706_vm6, %vm793_vm1  ;;  %v883_v43 = vsel %vm793_vm1, 0.0, %v1852_v3  ;;  %v879_v4 = vsel %vm792_vm2, 0.0, %v1807_v47  ;;  %v940_v60 = vadd.f32 %v939_v58, %v876_v39  ;;  %v2190_v47 = vsel %vm639_vm13, %v2661_v8, %v2660_v23 }
  0xdb   : > { %v882_v21 = vsel %vm818_vm3, 0.0, %v1845_v59  ;;  %vm814_vm4 = vmor %vm706_vm6, %vm792_vm2  ;;  %v935_v35 = vadd.f32 %v934_v34, %v872_v13  ;;  %v880_v54 = vsel %vm792_vm2, 0.0, %v1828_v55  ;;  %v884_v55 = vsel %vm793_vm1, 0.0, %v1886_v45 }
  0xdc   : > { %v878_v3 = vsel %vm814_vm4, 0.0, %v1797_v0  ;;  %v759_v51 = vpop.permute.xlu1 %758  ;;  %v756_v58 = vpop.permute.xlu0 %755  ;;  %v941_v59 = vadd.f32 %v940_v60, %v877_v37  ;;  %v949_v39 = vadd.f32 %v883_v43, %v882_v21  ;;  %v2665_v43 = vld [vmem:[#allocation64_spill] sm:$0xff]  ;;  %v2667_v21 = vld [vmem:[#allocation65_spill] sm:$0xff]  ;;  %v881_v8 = vsel %vm792_vm2, 0.0, %v1873_v44 }
  0xdd   : > { %vm795_vm5 = vcmp.eq.s32.totalorder %v759_v51, 1  ;;  %vm794_vm7 = vcmp.eq.s32.totalorder %v756_v58, 1  ;;  %v936_v41 = vadd.f32 %v935_v35, %v873_v7  ;;  %v944_v12 = vadd.f32 %v879_v4, %v878_v3 }
  0xde   : > { %vm2198_vm8 = vmor %vm706_vm6, %vm795_vm5  ;;  %v891_v0 = vsel %vm795_vm5, 0.0, %v1896_v63  ;;  %v887_v60 = vsel %vm794_vm7, 0.0, %v1904_v50  ;;  %942 = vadd.xlane.f32.xlu1 %v941_v59  ;;  %v2213_v4 = vsel %vm634_vm14, %v2665_v43, %v2664_v9  ;;  %v2666_v50 = vld [vmem:[#allocation67_spill] sm:$0xff]  ;;  %v950_v3 = vadd.f32 %v949_v39, %v884_v55 }
  0xdf   : > { %v890_v13 = vsel %vm2198_vm8, 0.0, %v1892_v61  ;;  %vm822_vm9 = vmor %vm706_vm6, %vm794_vm7  ;;  %937 = vadd.xlane.f32.xlu0 %v936_v41  ;;  %v945_v63 = vadd.f32 %v944_v12, %v880_v54  ;;  %v2228_v37 = vsel %vm635_vm0, %v2667_v21, %v2666_v50  ;;  %v888_v44 = vsel %vm794_vm7, 0.0, %v1914_v25 }
  0xe0   : > { %v886_v35 = vsel %vm822_vm9, 0.0, %v1900_v40  ;;  %v765_v23 = vpop.permute.xlu1 %764  ;;  %v762_v61 = vpop.permute.xlu0 %761  ;;  %v959_v59 = vadd.f32 %v891_v0, %v890_v13  ;;  %v885_v39 = vsel %vm793_vm1, 0.0, %v1925_v14  ;;  %v893_v9 = vsel %vm795_vm5, 0.0, %v1977_v42 }
  0xe1   : > { %vm797_vm10 = vcmp.eq.s32.totalorder %v765_v23, 1  ;;  %vm796_vm11 = vcmp.eq.s32.totalorder %v762_v61, 1  ;;  %v946_v7 = vadd.f32 %v945_v63, %v881_v8  ;;  %v954_v45 = vadd.f32 %v887_v60, %v886_v35  ;;  %v2677_v61 = vld [vmem:[#allocation42_spill] sm:$0xff] }
  0xe2   : > { %vm2236_vm12 = vmor %vm706_vm6, %vm797_vm10  ;;  %v899_v40 = vsel %vm797_vm10, 0.0, %v1948_v33  ;;  %v895_v11 = vsel %vm796_vm11, 0.0, %v1956_v31  ;;  %v889_v33 = vsel %vm794_vm7, 0.0, %v1918_v38  ;;  %v892_v31 = vsel %vm795_vm5, 0.0, %v1938_v52 }
  0xe3   : > { %v898_v41 = vsel %vm2236_vm12, 0.0, %v1944_v36  ;;  %vm830_vm13 = vmor %vm706_vm6, %vm796_vm11  ;;  %947 = vadd.xlane.f32.xlu0 %v946_v7  ;;  %v955_v12 = vadd.f32 %v954_v45, %v888_v44  ;;  %v951_v34 = vadd.f32 %v950_v3, %v885_v39  ;;  %v960_v0 = vadd.f32 %v959_v59, %v892_v31  ;;  %v2678_v3 = vld [vmem:[#allocation5_spill] sm:$0xff]  ;;  %v2679_v7 = vld [vmem:[#allocation22_spill] sm:$0xff] }
  0xe4   : > { %v894_v25 = vsel %vm830_vm13, 0.0, %v1952_v46  ;;  %v771_v30 = vpop.permute.xlu1 %770  ;;  %v768_v14 = vpop.permute.xlu0 %767  ;;  %v969_v60 = vadd.f32 %v899_v40, %v898_v41  ;;  %v896_v58 = vsel %vm796_vm11, 0.0, %v1966_v56  ;;  %v900_v42 = vsel %vm797_vm10, 0.0, %v1991_v2  ;;  %v2683_v44 = vld [vmem:[#allocation24_spill] sm:$0xff] }
  0xe5   : > { %vm799_vm14 = vcmp.eq.s32.totalorder %v771_v30, 1  ;;  %vm798_vm15 = vcmp.eq.s32.totalorder %v768_v14, 1  ;;  %v956_v36 = vadd.f32 %v955_v12, %v889_v33  ;;  %v964_v54 = vadd.f32 %v895_v11, %v894_v25  ;;  %v2684_v33 = vld [vmem:[#allocation25_spill] sm:$0xff]  ;;  %v2685_v12 = vld [vmem:[#allocation26_spill] sm:$0xff] }
  0xe6   : > { %vm2262_vm0 = vmor %vm706_vm6, %vm799_vm14  ;;  %v907_v52 = vsel %vm799_vm14, 0.0, %v2001_v49  ;;  %v903_v46 = vsel %vm798_vm15, 0.0, %v2009_v17  ;;  %v897_v17 = vsel %vm796_vm11, 0.0, %v1970_v5  ;;  %vm636_vm2 = vcmp.eq.s32.totalorder %v1735_v27, %v2047_v19  ;;  %v2697_v11 = vld [vmem:[#allocation85_spill] sm:$0xff] }
  0xe7   : > { %v906_v43 = vsel %vm2262_vm0, 0.0, %v1997_v10  ;;  %vm2280_vm1 = vmor %vm706_vm6, %vm798_vm15  ;;  %957 = vadd.xlane.f32.xlu1 %v956_v36  ;;  %952 = vadd.xlane.f32.xlu0 %v951_v34  ;;  %v965_v56 = vadd.f32 %v964_v54, %v896_v58  ;;  %v961_v63 = vadd.f32 %v960_v0, %v893_v9  ;;  %v970_v55 = vadd.f32 %v969_v60, %v900_v42  ;;  %v2688_v58 = vld [vmem:[#allocation40_spill] sm:$0xff] }
  0xe8   : > { %v902_v10 = vsel %vm2280_vm1, 0.0, %v2005_v24  ;;  %v2293_v49 = vpop.permute.xlu1 %776  ;;  %v774_v51 = vpop.permute.xlu0 %773  ;;  %v979_v50 = vadd.f32 %v907_v52, %v906_v43  ;;  %v2676_v24 = vld [vmem:[#allocation27_spill] sm:$0xff]  ;;  %v904_v59 = vsel %vm798_vm15, 0.0, %v2678_v3  ;;  %v901_v45 = vsel %vm797_vm10, 0.0, %v2679_v7  ;;  %v2689_v43 = vld [vmem:[#allocation6_spill] sm:$0xff] }
  0xe9   : > { %vm801_vm3 = vcmp.eq.s32.totalorder %v2293_v49, 1  ;;  %vm800_vm4 = vcmp.eq.s32.totalorder %v774_v51, 1  ;;  %v966_v5 = vadd.f32 %v965_v56, %v897_v17  ;;  %v974_v21 = vadd.f32 %v903_v46, %v902_v10 }
  0xea   : > { %vm2300_vm5 = vmor %vm706_vm6, %vm801_vm3  ;;  %v915_v35 = vsel %vm801_vm3, 0.0, %v2676_v24  ;;  %v911_v8 = vsel %vm800_vm4, 0.0, %v2677_v61  ;;  %v905_v39 = vsel %vm798_vm15, 0.0, %v2683_v44  ;;  %v908_v23 = vsel %vm799_vm14, 0.0, %v2684_v33 }
  0xeb   : > { %v914_v40 = vsel %vm2300_vm5, 0.0, %v2680_v28  ;;  %vm2319_vm7 = vmor %vm706_vm6, %vm800_vm4  ;;  %967 = vadd.xlane.f32.xlu1 %v966_v5  ;;  %962 = vadd.xlane.f32.xlu0 %v961_v63  ;;  %v975_v41 = vadd.f32 %v974_v21, %v904_v59  ;;  %vm640_vm8 = vcmp.eq.s32.totalorder %v1735_v27, %v2045_v1  ;;  %v971_v0 = vadd.f32 %v970_v55, %v901_v45  ;;  %v2695_v45 = vld [vmem:[#allocation87_spill] sm:$0xff]  ;;  %v2696_v28 = vld [vmem:[#allocation84_spill] sm:$0xff] }
  0xec   : > { %v910_v31 = vsel %vm2319_vm7, 0.0, %v2685_v12  ;;  %v2332_v25 = vpop.permute.xlu1 %782  ;;  %v780_v34 = vpop.permute.xlu0 %779  ;;  %v980_v60 = vadd.f32 %v979_v50, %v908_v23  ;;  %v989_v36 = vadd.f32 %v915_v35, %v914_v40  ;;  %vm633_vm9 = vcmp.eq.s32.totalorder %v1747_v22, %v1993_v20  ;;  %v2693_v35 = vld [vmem:[#allocation86_spill] sm:$0xff] }
  0xed   : > { %vm803_vm10 = vcmp.eq.s32.totalorder %v2332_v25, 1  ;;  %vm802_vm11 = vcmp.eq.s32.totalorder %v780_v34, 1  ;;  %v976_v14 = vadd.f32 %v975_v41, %v905_v39  ;;  %v984_v54 = vadd.f32 %v911_v8, %v910_v31  ;;  %v2699_v41 = vld [vmem:[#allocation89_spill] sm:$0xff]  ;;  %v2703_v31 = vld [vmem:[#allocation90_spill] sm:$0xff] }
  0xee   : > { %vm2341_vm12 = vmor %vm706_vm6, %vm803_vm10  ;;  %v923_v52 = vsel %vm803_vm10, 0.0, %v2105_v6  ;;  %v919_v46 = vsel %vm802_vm11, 0.0, %v2113_v18  ;;  %v912_v9 = vsel %vm800_vm4, 0.0, %v2688_v58  ;;  %v909_v13 = vsel %vm799_vm14, 0.0, %v2689_v43  ;;  %v2690_v6 = vld [vmem:[#allocation8_spill] sm:$0xff] }
  0xef   : > { %v922_v17 = vsel %vm2341_vm12, 0.0, %v2101_v62  ;;  %vm854_vm13 = vmor %vm706_vm6, %vm802_vm11  ;;  %977 = vadd.xlane.f32.xlu1 %v976_v14  ;;  %972 = vadd.xlane.f32.xlu0 %v971_v0  ;;  %v913_v56 = vsel %vm800_vm4, 0.0, %v2690_v6  ;;  %v985_v18 = vadd.f32 %v984_v54, %v912_v9  ;;  %v916_v42 = vsel %vm801_vm3, 0.0, %v2097_v29 }
  0xf0   : > { %v918_v30 = vsel %vm854_vm13, 0.0, %v2109_v15  ;;  %v789_v10 = vpop.permute.xlu1 %788  ;;  %v786_v63 = vpop.permute.xlu0 %785  ;;  %v981_v55 = vadd.f32 %v980_v60, %v909_v13  ;;  %v990_v62 = vadd.f32 %v989_v36, %v916_v42  ;;  %v999_v50 = vadd.f32 %v923_v52, %v922_v17 }
  0xf1   : > { %vm805_vm14 = vcmp.eq.s32.totalorder %v789_v10, 1  ;;  %vm804_vm15 = vcmp.eq.s32.totalorder %v786_v63, 1  ;;  %v986_v5 = vadd.f32 %v985_v18, %v913_v56  ;;  %v994_v21 = vadd.f32 %v919_v46, %v918_v30 }
  0xf2   : > { %vm2369_vm0 = vmor %vm706_vm6, %vm805_vm14  ;;  %v931_v29 = vsel %vm805_vm14, 0.0, %v2190_v47  ;;  %v927_v15 = vsel %vm804_vm15, 0.0, %v2228_v37  ;;  %v920_v2 = vsel %vm802_vm11, 0.0, %v2121_v57  ;;  %vm637_vm1 = vcmp.eq.s32.totalorder %v1747_v22, %v2047_v19  ;;  %v2694_v57 = vld [vmem:[#allocation83_spill] sm:$0xff] }
  0xf3   : > { %v930_v24 = vsel %vm2369_vm0, 0.0, %v2166_v53  ;;  %vm862_vm4 = vmor %vm706_vm6, %vm804_vm15  ;;  %987 = vadd.xlane.f32.xlu1 %v986_v5  ;;  %982 = vadd.xlane.f32.xlu0 %v981_v55  ;;  %v995_v47 = vadd.f32 %v994_v21, %v920_v2  ;;  %v917_v37 = vsel %vm801_vm3, 0.0, %v2141_v48  ;;  %v700_v61 = vsel %vm636_vm2, %v2694_v57, %v2693_v35  ;;  %v2702_v19 = vld [vmem:[#allocation91_spill] sm:$0xff] }
  0xf4   : > { %v926_v8 = vsel %vm862_vm4, 0.0, %v2213_v4  ;;  %v921_v53 = vsel %vm802_vm11, 0.0, %v2134_v26  ;;  %v991_v32 = vadd.f32 %v990_v62, %v917_v37  ;;  %v924_v3 = vsel %vm803_vm10, 0.0, %v2156_v16  ;;  %v2700_v16 = vld [vmem:[#allocation88_spill] sm:$0xff] }
  0xf5   : > { %v996_v59 = vadd.f32 %v995_v47, %v921_v53  ;;  %v1004_v7 = vadd.f32 %v927_v15, %v926_v8  ;;  %v1000_v49 = vadd.f32 %v999_v50, %v924_v3  ;;  %v1009_v48 = vadd.f32 %v931_v29, %v930_v24 }
  0xf6   : > { %v701_v40 = vsel %vm637_vm1, %v2696_v28, %v2695_v45  ;;  %v928_v4 = vsel %vm804_vm15, 0.0, %v700_v61  ;;  %v2698_v44 = vsub.f32 -0.105360515, %v2697_v11  ;;  %v697_v33 = vsel %vm633_vm9, %v2700_v16, %v2699_v41 }
  0xf7   : > { %997 = vadd.xlane.f32.xlu1 %v996_v59  ;;  %992 = vadd.xlane.f32.xlu0 %v991_v32  ;;  %v1005_v39 = vadd.f32 %v1004_v7, %v928_v4  ;;  %v2701_v23 = vsub.f32 -8.536996, %v2697_v11  ;;  %v704_v34 = vsel %vm640_vm8, %v2703_v31, %v2702_v19  ;;  %v929_v0 = vsel %vm804_vm15, 0.0, %v701_v40 }
  0xf8   : > { %v401_v26 = vmul.f32 0.9, %v2698_v44  ;;  %v925_v60 = vsel %vm803_vm10, 0.0, %v697_v33  ;;  %vm641_vm6 = vcmp.eq.s32.totalorder %v1747_v22, %v2045_v1  ;;  %v932_v20 = vsel %vm805_vm14, 0.0, %v704_v34 }
  0xf9   : > { %v529_v12 = vmul.f32 0.00019607843, %v2701_v23  ;;  %v1006_v36 = vadd.f32 %v1005_v39, %v929_v0  ;;  %v1001_v14 = vadd.f32 %v1000_v49, %v925_v60  ;;  %v1010_v54 = vadd.f32 %v1009_v48, %v932_v20 }
  0xfa   : > { %vm1014_vm2 = vcmask 7168  }
  0xfb   : > { %1007 = vadd.xlane.f32.xlu1 %v1006_v36  ;;  %1002 = vadd.xlane.f32.xlu0 %v1001_v14  ;;  %v705_v38 = vsel %vm641_vm6, %v401_v26, %v529_v12 }
  0xfc   : > { %v933_v52 = vsel %vm805_vm14, 0.0, %v705_v38 }
  0xfd   : > { %v1011_v27 = vadd.f32 %v1010_v54, %v933_v52 }
  0xff   : > { %1012 = vadd.xlane.f32.xlu0 %v1011_v27 }
 0x167   : > { %v943_v22 = vpop.xlane.xlu1 %942 }
 0x168   : > { %1016 = vst.msk [vmem:[%s2433_s28 + $0x8] sm:$0xff] %vm1014_vm2, %v943_v22  ;;  %v938_v1 = vpop.xlane.xlu0 %937 }
 0x169   : > { %1015 = vst.msk [vmem:[%s2433_s28] sm:$0xff] %vm1014_vm2, %v938_v1 }
 0x16c   : > { %v948_v25 = vpop.xlane.xlu0 %947 }
 0x16d   : > { %1017 = vst.msk [vmem:[%s2433_s28 + $0x10] sm:$0xff] %vm1014_vm2, %v948_v25 }
 0x170   : > { %v958_v46 = vpop.xlane.xlu1 %957  ;;  %v953_v58 = vpop.xlane.xlu0 %952 }
 0x171   : > { %1019 = vst.msk [vmem:[%s2433_s28 + $0x20] sm:$0xff] %vm1014_vm2, %v958_v46  ;;  %1018 = vst.msk [vmem:[%s2433_s28 + $0x18] sm:$0xff] %vm1014_vm2, %v953_v58 }
 0x174   : > { %v968_v9 = vpop.xlane.xlu1 %967  ;;  %v963_v43 = vpop.xlane.xlu0 %962 }
 0x175   : > { %1021 = vst.msk [vmem:[%s2433_s28 + $0x30] sm:$0xff] %vm1014_vm2, %v968_v9  ;;  %1020 = vst.msk [vmem:[%s2433_s28 + $0x28] sm:$0xff] %vm1014_vm2, %v963_v43 }
 0x178   : > { %v978_v13 = vpop.xlane.xlu1 %977  ;;  %v973_v17 = vpop.xlane.xlu0 %972 }
 0x179   : > { %1023 = vst.msk [vmem:[%s2433_s28 + $0x40] sm:$0xff] %vm1014_vm2, %v978_v13  ;;  %1022 = vst.msk [vmem:[%s2433_s28 + $0x38] sm:$0xff] %vm1014_vm2, %v973_v17 }
 0x17c   : > { %v988_v6 = vpop.xlane.xlu1 %987  ;;  %v983_v56 = vpop.xlane.xlu0 %982 }
 0x17d   : > { %1025 = vst.msk [vmem:[%s2433_s28 + $0x50] sm:$0xff] %vm1014_vm2, %v988_v6  ;;  %1024 = vst.msk [vmem:[%s2433_s28 + $0x48] sm:$0xff] %vm1014_vm2, %v983_v56 }
 0x180   : > { %v998_v18 = vpop.xlane.xlu1 %997  ;;  %v993_v42 = vpop.xlane.xlu0 %992 }
 0x181   : > { %1027 = vst.msk [vmem:[%s2433_s28 + $0x60] sm:$0xff] %vm1014_vm2, %v998_v18  ;;  %1026 = vst.msk [vmem:[%s2433_s28 + $0x58] sm:$0xff] %vm1014_vm2, %v993_v42 }
 0x184   : > { %v1008_v30 = vpop.xlane.xlu1 %1007  ;;  %v1003_v10 = vpop.xlane.xlu0 %1002 }
 0x185   : > { %1029 = vst.msk [vmem:[%s2433_s28 + $0x70] sm:$0xff] %vm1014_vm2, %v1008_v30  ;;  %1028 = vst.msk [vmem:[%s2433_s28 + $0x68] sm:$0xff] %vm1014_vm2, %v1003_v10 }
 0x188   : > { %v1013_v63 = vpop.xlane.xlu0 %1012 }
 0x189   : > { %1030 = vst.msk [vmem:[%s2433_s28 + $0x78] sm:$0xff] %vm1014_vm2, %v1013_v63 }
 0x18a PF: > { %p12_p9 = scmp.ge.s32.totalorder %s1275_s14, 5   ;;  %s2704_s9 = smov %s1226_s10 }
 0x18b   : > { %s2705_s10 = smov %s1230_s11  ;;  %s2706_s11 = smov %s1285_s17 }
 0x18c   : > { %s2707_s12 = smov %s1275_s14  ;;  %14 = sbr.rel (!%p12_p9) target bundleno = 3 (0x3), region = 71 }
 0x191   :  { %1053 = vsyncpa [#allocation3], 1 }
 0x192   :  { %1055 = vsyncpa [#allocation3 + $0x1], 1 }

</bundles_post_ra>
